<compile_context>
chip_gen: v7x
topology: tpu7x:2x2x1
jax: 0.10.0
libtpu: 0.0.40
codegen_flags: <defaults>
</compile_context>

<pallas_src>
import jax
import jax.numpy as jnp
from jax import lax
from jax.experimental import pallas as pl
from jax.experimental.pallas import tpu as pltpu
import numpy as np

_BBLK = 8  # batch rows per grid step (fills the 8 sublanes)


def _ph0_kernel(x_ref, out_ref):
    """H0 persistence for a tile of point clouds.

    x_ref:   (Bblk, N, C) f32 -- Bblk point clouds of N points in R^C
    out_ref: (Bblk, N)    f32 -- N-1 MST edge lengths (H0 deaths) ascending,
                                 followed by a 0.0 pad in the last slot.
    """
    Bblk, N, C = x_ref.shape
    x = x_ref[...].astype(jnp.float32)
    inf = jnp.float32(jnp.inf)

    # ---- pairwise *squared* distances (sqrt deferred to the final vector) ----
    if C > 16:
        # MXU gram path for wide channels.
        # TODO(synk): gram formula can lose precision for near-duplicate points.
        sq = jnp.sum(x * x, axis=-1)                                # (Bblk, N)
        gram = jnp.einsum("bic,bjc->bij", x, x,
                          preferred_element_type=jnp.float32)       # (Bblk, N, N)
        d2 = jnp.maximum(sq[:, :, None] + sq[:, None, :] - 2.0 * gram, 0.0)
    else:
        # Difference path: exact (no cancellation); C small => C cheap VPU passes.
        d2 = jnp.zeros((Bblk, N, N), jnp.float32)
        for c in range(C):                                          # static unroll
            col = x[:, :, c]                                        # (Bblk, N)
            diff = col[:, :, None] - col[:, None, :]                # (Bblk, N, N)
            d2 = d2 + diff * diff

    lane = lax.broadcasted_iota(jnp.int32, (Bblk, N), 1)            # (Bblk, N)

    # ---- Prim's MST on squared distances, vectorized over the batch sublanes.
    # Frozen-key trick: a visited vertex's key is never lowered again, so after
    # N iterations `key` holds the squared weight of the edge that attached each
    # vertex (root keeps an exact 0). No per-iteration weight scatter needed.
    key0 = jnp.where(lane == 0, jnp.float32(0.0), inf)              # (Bblk, N)
    visited0 = jnp.zeros((Bblk, N), jnp.int32)

    def body(_, carry):
        key, visited = carry
        vis = visited > 0
        masked = jnp.where(vis, inf, key)                           # (Bblk, N)
        w = jnp.min(masked, axis=1, keepdims=True)                  # (Bblk, 1)
        idx = jnp.min(jnp.where(masked == w, lane, N),
                      axis=1, keepdims=True)                        # (Bblk, 1) argmin
        newly = lane == idx                                         # one-hot per row
        vis = vis | newly
        # Fetch d2[b, idx_b, :] for every cloud with one MXU matvec per row
        # (replaces the old O(N^2) select + sublane reduce per iteration).
        d_row = jnp.einsum("bqi,bij->bqj",
                           newly.astype(jnp.float32)[:, None, :], d2,
                           preferred_element_type=jnp.float32)[:, 0, :]
        key = jnp.where(vis, key, jnp.minimum(key, d_row))
        return key, vis.astype(jnp.int32)

    unroll = True if N <= 32 else 8
    key2, _ = lax.fori_loop(0, N, body, (key0, visited0), unroll=unroll)

    # ---- only N sqrts (EUP), not N^2 ----
    vals = jnp.sqrt(key2)                                           # (Bblk, N)

    # ---- stable ascending rank-sort; root (exact 0, rank 0) is routed to the
    # last slot which is exactly the [0, 0] padding the reference produces.
    vi = vals[:, :, None]                                           # (Bblk, N, 1)
    vj = vals[:, None, :]                                           # (Bblk, 1, N)
    ii = lax.broadcasted_iota(jnp.int32, (Bblk, N, N), 1)
    jj = lax.broadcasted_iota(jnp.int32, (Bblk, N, N), 2)
    before = (vj < vi) | ((vj == vi) & (jj < ii))                   # j sorts before i
    rank = jnp.sum(before.astype(jnp.int32), axis=2)                # (Bblk, N)
    rank = jnp.where(rank == 0, N - 1, rank - 1)                    # root -> last slot
    sel = (rank[:, :, None] == jj).astype(jnp.float32)              # (Bblk, N, N)
    # Scatter on the MXU instead of an (N, N) select + sublane reduce.
    sorted_vals = jnp.einsum("bqi,bip->bqp", vals[:, None, :], sel,
                             preferred_element_type=jnp.float32)[:, 0, :]
    out_ref[...] = sorted_vals


def persistent_homology_h0(x):
    """x: (B, N, C) -> (B, N, 2) float32, rows = [death, birth]."""
    x = jnp.asarray(x, jnp.float32)
    B, N, C = x.shape
    b_pad = ((B + _BBLK - 1) // _BBLK) * _BBLK
    if b_pad != B:
        # Zero point clouds are well-defined (all-zero deaths) and sliced away below.
        x = jnp.concatenate([x, jnp.zeros((b_pad - B, N, C), jnp.float32)], axis=0)

    # VMEM budget: a handful of (Bblk, N, N) f32 temporaries are live at once.
    est = 4 * _BBLK * N * N * 6 + 4 * _BBLK * N * (C + 8) + (1 << 20)
    compiler_kwargs = dict(dimension_semantics=("parallel",))
    if est > 24 * 1024 * 1024:
        # Stay below v7x's 64 MiB physical VMEM.
        compiler_kwargs["vmem_limit_bytes"] = int(min(2 * est, 60 * 1024 * 1024))

    deaths = pl.pallas_call(
        _ph0_kernel,
        out_shape=jax.ShapeDtypeStruct((b_pad, N), jnp.float32),
        grid_spec=pltpu.PrefetchScalarGridSpec(
            num_scalar_prefetch=0,
            grid=(b_pad // _BBLK,),
            in_specs=[pl.BlockSpec((_BBLK, N, C), lambda b: (b, 0, 0))],
            out_specs=pl.BlockSpec((_BBLK, N), lambda b: (b, 0)),
        ),
        compiler_params=pltpu.CompilerParams(**compiler_kwargs),
    )(x)

    deaths = deaths[:B]                                             # (B, N)
    births = jnp.zeros_like(deaths)
    # Reference does persistence_tensor[..., [1, 0]] -> [death, birth]
    return jnp.stack([deaths, births], axis=-1)                     # (B, N, 2)


def _numpy_reference(x):
    """Pure-numpy H0 (MST deaths, ascending) reference for the same semantics."""
    x = np.asarray(x, dtype=np.float32)
    B, N, _ = x.shape
    out = np.zeros((B, N, 2), dtype=np.float32)
    for b in range(B):
        pts = x[b]
        d = np.sqrt(np.maximum(
            ((pts[:, None, :] - pts[None, :, :]) ** 2).sum(-1), 0.0))
        in_tree = np.zeros(N, bool)
        key = np.full(N, np.inf)
        key[0] = 0.0
        mst = []
        for _ in range(N):
            i = np.argmin(np.where(in_tree, np.inf, key))
            mst.append(key[i])
            in_tree[i] = True
            key = np.minimum(key, d[i])
        deaths = np.sort(np.array(mst[1:], dtype=np.float32))       # drop root, sort asc
        out[b, :N - 1, 0] = deaths                                  # [death, birth=0]
    return out


if __name__ == "__main__":
    key = jax.random.PRNGKey(0)
    batch, seq_len, num_channels = 2, 8, 4
    x = jax.random.normal(key, (batch, seq_len, num_channels), dtype=jnp.float32)

    out = jax.block_until_ready(persistent_homology_h0(x))

    ref = _numpy_reference(np.asarray(x))
    np.testing.assert_allclose(np.asarray(out), ref, rtol=1e-5, atol=1e-5)

    # TODO(synk): exact tie-breaking order of equal-death bars in giotto-tda/ripser
    # is library-internal; we use ascending-death order (the standard H0 output).
    print("KERNEL_OK")
</pallas_src>

<mosaic_0001>
module attributes {stable_mosaic.version = 11 : i64} {
  func.func @_ph0_kernel(%arg0: i32, %arg1: memref<8x8x4xf32, #tpu.memory_space<vmem>>, %arg2: memref<8x8xf32, #tpu.memory_space<vmem>>) attributes {dimension_semantics = [#tpu.dimension_semantics<parallel>], iteration_bounds = array<i64: 1>, scalar_prefetch = 0 : i64, scratch_operands = 0 : i64, tpu.core_type = #tpu.core_type<tc>, window_params = [{transform_indices = @transform_0, window_bounds = array<i64: 8, 8, 4>}, {transform_indices = @transform_1, window_bounds = array<i64: 8, 8>}]} {
    %c0 = arith.constant 0 : index
    %c0_0 = arith.constant 0 : index
    %c0_1 = arith.constant 0 : index
    %0 = vector.load %arg1[%c0, %c0_0, %c0_1] : memref<8x8x4xf32, #tpu.memory_space<vmem>>, vector<8x8x4xf32>
    %cst = arith.constant 0.000000e+00 : f32
    %1 = vector.broadcast %cst : f32 to vector<8x8x8xf32>
    %2 = vector.extract_strided_slice %0 {offsets = [0, 0, 0], sizes = [8, 8, 1], strides = [1, 1, 1]} : vector<8x8x4xf32> to vector<8x8x1xf32>
    %3 = vector.shape_cast %2 : vector<8x8x1xf32> to vector<8x8xf32>
    %4 = vector.shape_cast %3 : vector<8x8xf32> to vector<8x8x1xf32>
    %5 = vector.shape_cast %3 : vector<8x8xf32> to vector<8x1x8xf32>
    %6 = vector.broadcast %4 : vector<8x8x1xf32> to vector<8x8x8xf32>
    %7 = vector.broadcast %5 : vector<8x1x8xf32> to vector<8x8x8xf32>
    %8 = arith.subf %6, %7 : vector<8x8x8xf32>
    %9 = arith.mulf %8, %8 : vector<8x8x8xf32>
    %10 = arith.addf %1, %9 : vector<8x8x8xf32>
    %11 = vector.extract_strided_slice %0 {offsets = [0, 0, 1], sizes = [8, 8, 1], strides = [1, 1, 1]} : vector<8x8x4xf32> to vector<8x8x1xf32>
    %12 = vector.shape_cast %11 : vector<8x8x1xf32> to vector<8x8xf32>
    %13 = vector.shape_cast %12 : vector<8x8xf32> to vector<8x8x1xf32>
    %14 = vector.shape_cast %12 : vector<8x8xf32> to vector<8x1x8xf32>
    %15 = vector.broadcast %13 : vector<8x8x1xf32> to vector<8x8x8xf32>
    %16 = vector.broadcast %14 : vector<8x1x8xf32> to vector<8x8x8xf32>
    %17 = arith.subf %15, %16 : vector<8x8x8xf32>
    %18 = arith.mulf %17, %17 : vector<8x8x8xf32>
    %19 = arith.addf %10, %18 : vector<8x8x8xf32>
    %20 = vector.extract_strided_slice %0 {offsets = [0, 0, 2], sizes = [8, 8, 1], strides = [1, 1, 1]} : vector<8x8x4xf32> to vector<8x8x1xf32>
    %21 = vector.shape_cast %20 : vector<8x8x1xf32> to vector<8x8xf32>
    %22 = vector.shape_cast %21 : vector<8x8xf32> to vector<8x8x1xf32>
    %23 = vector.shape_cast %21 : vector<8x8xf32> to vector<8x1x8xf32>
    %24 = vector.broadcast %22 : vector<8x8x1xf32> to vector<8x8x8xf32>
    %25 = vector.broadcast %23 : vector<8x1x8xf32> to vector<8x8x8xf32>
    %26 = arith.subf %24, %25 : vector<8x8x8xf32>
    %27 = arith.mulf %26, %26 : vector<8x8x8xf32>
    %28 = arith.addf %19, %27 : vector<8x8x8xf32>
    %29 = vector.extract_strided_slice %0 {offsets = [0, 0, 3], sizes = [8, 8, 1], strides = [1, 1, 1]} : vector<8x8x4xf32> to vector<8x8x1xf32>
    %30 = vector.shape_cast %29 : vector<8x8x1xf32> to vector<8x8xf32>
    %31 = vector.shape_cast %30 : vector<8x8xf32> to vector<8x8x1xf32>
    %32 = vector.shape_cast %30 : vector<8x8xf32> to vector<8x1x8xf32>
    %33 = vector.broadcast %31 : vector<8x8x1xf32> to vector<8x8x8xf32>
    %34 = vector.broadcast %32 : vector<8x1x8xf32> to vector<8x8x8xf32>
    %35 = arith.subf %33, %34 : vector<8x8x8xf32>
    %36 = arith.mulf %35, %35 : vector<8x8x8xf32>
    %37 = arith.addf %28, %36 : vector<8x8x8xf32>
    %38 = tpu.iota {dimensions = array<i32: 1>} : vector<8x8xi32>
    %c0_i32 = arith.constant 0 : i32
    %39 = vector.broadcast %c0_i32 : i32 to vector<8x8xi32>
    %40 = arith.cmpi eq, %38, %39 : vector<8x8xi32>
    %cst_2 = arith.constant 0.000000e+00 : f32
    %cst_3 = arith.constant 0x7F800000 : f32
    %41 = vector.broadcast %cst_2 : f32 to vector<8x8xf32>
    %42 = vector.broadcast %cst_3 : f32 to vector<8x8xf32>
    %43 = arith.select %40, %41, %42 : vector<8x8xi1>, vector<8x8xf32>
    %c0_i32_4 = arith.constant 0 : i32
    %44 = vector.broadcast %c0_i32_4 : i32 to vector<8x8xi32>
    %cst_5 = arith.constant 0x7F800000 : f32
    %c0_i32_6 = arith.constant 0 : i32
    %c0_i32_7 = arith.constant 0 : i32
    %45 = vector.broadcast %c0_i32_7 : i32 to vector<8x8xi32>
    %46 = arith.cmpi sgt, %44, %45 : vector<8x8xi32>
    %47 = vector.broadcast %cst_5 : f32 to vector<8x8xf32>
    %48 = arith.select %46, %47, %43 : vector<8x8xi1>, vector<8x8xf32>
    %cst_8 = arith.constant dense<0x7F800000> : vector<8xf32>
    %49 = vector.multi_reduction <minimumf>, %48, %cst_8 [1] : vector<8x8xf32> to vector<8xf32>
    %50 = vector.shape_cast %49 : vector<8xf32> to vector<8x1xf32>
    %51 = vector.broadcast %50 : vector<8x1xf32> to vector<8x8xf32>
    %52 = arith.cmpf oeq, %48, %51 : vector<8x8xf32>
    %c8_i32 = arith.constant 8 : i32
    %53 = vector.broadcast %c8_i32 : i32 to vector<8x8xi32>
    %54 = arith.select %52, %38, %53 : vector<8x8xi1>, vector<8x8xi32>
    %cst_9 = arith.constant dense<2147483647> : vector<8xi32>
    %55 = vector.multi_reduction <minsi>, %54, %cst_9 [1] : vector<8x8xi32> to vector<8xi32>
    %56 = vector.shape_cast %55 : vector<8xi32> to vector<8x1xi32>
    %57 = vector.broadcast %56 : vector<8x1xi32> to vector<8x8xi32>
    %58 = arith.cmpi eq, %38, %57 : vector<8x8xi32>
    %59 = arith.ori %46, %58 : vector<8x8xi1>
    %60 = arith.extui %58 : vector<8x8xi1> to vector<8x8xi32>
    %61 = arith.sitofp %60 : vector<8x8xi32> to vector<8x8xf32>
    %62 = vector.shape_cast %61 : vector<8x8xf32> to vector<8x1x8xf32>
    "tpu.trace_start"() <{level = 10 : i32, message = "bqi,bij->bqj"}> : () -> ()
    %cst_10 = arith.constant dense<0.000000e+00> : vector<8x1x8xf32>
    %63 = tpu.matmul %62, %37, %cst_10 {dimension_numbers = #tpu.dot_dimension_numbers<[2], [1], [1], [2], [0, 0, 0, 1, 1, 2], [0], [0]>} : vector<8x1x8xf32>, vector<8x8x8xf32>, vector<8x1x8xf32> -> vector<8x1x8xf32>
    "tpu.trace_stop"() : () -> ()
    %64 = vector.shape_cast %63 : vector<8x1x8xf32> to vector<8x8xf32>
    %65 = arith.minimumf %43, %64 : vector<8x8xf32>
    %66 = arith.select %59, %43, %65 : vector<8x8xi1>, vector<8x8xf32>
    %67 = arith.extui %59 : vector<8x8xi1> to vector<8x8xi32>
    %c1_i32 = arith.constant 1 : i32
    %c0_i32_11 = arith.constant 0 : i32
    %68 = vector.broadcast %c0_i32_11 : i32 to vector<8x8xi32>
    %69 = arith.cmpi sgt, %67, %68 : vector<8x8xi32>
    %70 = vector.broadcast %cst_5 : f32 to vector<8x8xf32>
    %71 = arith.select %69, %70, %66 : vector<8x8xi1>, vector<8x8xf32>
    %cst_12 = arith.constant dense<0x7F800000> : vector<8xf32>
    %72 = vector.multi_reduction <minimumf>, %71, %cst_12 [1] : vector<8x8xf32> to vector<8xf32>
    %73 = vector.shape_cast %72 : vector<8xf32> to vector<8x1xf32>
    %74 = vector.broadcast %73 : vector<8x1xf32> to vector<8x8xf32>
    %75 = arith.cmpf oeq, %71, %74 : vector<8x8xf32>
    %c8_i32_13 = arith.constant 8 : i32
    %76 = vector.broadcast %c8_i32_13 : i32 to vector<8x8xi32>
    %77 = arith.select %75, %38, %76 : vector<8x8xi1>, vector<8x8xi32>
    %cst_14 = arith.constant dense<2147483647> : vector<8xi32>
    %78 = vector.multi_reduction <minsi>, %77, %cst_14 [1] : vector<8x8xi32> to vector<8xi32>
    %79 = vector.shape_cast %78 : vector<8xi32> to vector<8x1xi32>
    %80 = vector.broadcast %79 : vector<8x1xi32> to vector<8x8xi32>
    %81 = arith.cmpi eq, %38, %80 : vector<8x8xi32>
    %82 = arith.ori %69, %81 : vector<8x8xi1>
    %83 = arith.extui %81 : vector<8x8xi1> to vector<8x8xi32>
    %84 = arith.sitofp %83 : vector<8x8xi32> to vector<8x8xf32>
    %85 = vector.shape_cast %84 : vector<8x8xf32> to vector<8x1x8xf32>
    "tpu.trace_start"() <{level = 10 : i32, message = "bqi,bij->bqj"}> : () -> ()
    %cst_15 = arith.constant dense<0.000000e+00> : vector<8x1x8xf32>
    %86 = tpu.matmul %85, %37, %cst_15 {dimension_numbers = #tpu.dot_dimension_numbers<[2], [1], [1], [2], [0, 0, 0, 1, 1, 2], [0], [0]>} : vector<8x1x8xf32>, vector<8x8x8xf32>, vector<8x1x8xf32> -> vector<8x1x8xf32>
    "tpu.trace_stop"() : () -> ()
    %87 = vector.shape_cast %86 : vector<8x1x8xf32> to vector<8x8xf32>
    %88 = arith.minimumf %66, %87 : vector<8x8xf32>
    %89 = arith.select %82, %66, %88 : vector<8x8xi1>, vector<8x8xf32>
    %90 = arith.extui %82 : vector<8x8xi1> to vector<8x8xi32>
    %c2_i32 = arith.constant 2 : i32
    %c0_i32_16 = arith.constant 0 : i32
    %91 = vector.broadcast %c0_i32_16 : i32 to vector<8x8xi32>
    %92 = arith.cmpi sgt, %90, %91 : vector<8x8xi32>
    %93 = vector.broadcast %cst_5 : f32 to vector<8x8xf32>
    %94 = arith.select %92, %93, %89 : vector<8x8xi1>, vector<8x8xf32>
    %cst_17 = arith.constant dense<0x7F800000> : vector<8xf32>
    %95 = vector.multi_reduction <minimumf>, %94, %cst_17 [1] : vector<8x8xf32> to vector<8xf32>
    %96 = vector.shape_cast %95 : vector<8xf32> to vector<8x1xf32>
    %97 = vector.broadcast %96 : vector<8x1xf32> to vector<8x8xf32>
    %98 = arith.cmpf oeq, %94, %97 : vector<8x8xf32>
    %c8_i32_18 = arith.constant 8 : i32
    %99 = vector.broadcast %c8_i32_18 : i32 to vector<8x8xi32>
    %100 = arith.select %98, %38, %99 : vector<8x8xi1>, vector<8x8xi32>
    %cst_19 = arith.constant dense<2147483647> : vector<8xi32>
    %101 = vector.multi_reduction <minsi>, %100, %cst_19 [1] : vector<8x8xi32> to vector<8xi32>
    %102 = vector.shape_cast %101 : vector<8xi32> to vector<8x1xi32>
    %103 = vector.broadcast %102 : vector<8x1xi32> to vector<8x8xi32>
    %104 = arith.cmpi eq, %38, %103 : vector<8x8xi32>
    %105 = arith.ori %92, %104 : vector<8x8xi1>
    %106 = arith.extui %104 : vector<8x8xi1> to vector<8x8xi32>
    %107 = arith.sitofp %106 : vector<8x8xi32> to vector<8x8xf32>
    %108 = vector.shape_cast %107 : vector<8x8xf32> to vector<8x1x8xf32>
    "tpu.trace_start"() <{level = 10 : i32, message = "bqi,bij->bqj"}> : () -> ()
    %cst_20 = arith.constant dense<0.000000e+00> : vector<8x1x8xf32>
    %109 = tpu.matmul %108, %37, %cst_20 {dimension_numbers = #tpu.dot_dimension_numbers<[2], [1], [1], [2], [0, 0, 0, 1, 1, 2], [0], [0]>} : vector<8x1x8xf32>, vector<8x8x8xf32>, vector<8x1x8xf32> -> vector<8x1x8xf32>
    "tpu.trace_stop"() : () -> ()
    %110 = vector.shape_cast %109 : vector<8x1x8xf32> to vector<8x8xf32>
    %111 = arith.minimumf %89, %110 : vector<8x8xf32>
    %112 = arith.select %105, %89, %111 : vector<8x8xi1>, vector<8x8xf32>
    %113 = arith.extui %105 : vector<8x8xi1> to vector<8x8xi32>
    %c3_i32 = arith.constant 3 : i32
    %c0_i32_21 = arith.constant 0 : i32
    %114 = vector.broadcast %c0_i32_21 : i32 to vector<8x8xi32>
    %115 = arith.cmpi sgt, %113, %114 : vector<8x8xi32>
    %116 = vector.broadcast %cst_5 : f32 to vector<8x8xf32>
    %117 = arith.select %115, %116, %112 : vector<8x8xi1>, vector<8x8xf32>
    %cst_22 = arith.constant dense<0x7F800000> : vector<8xf32>
    %118 = vector.multi_reduction <minimumf>, %117, %cst_22 [1] : vector<8x8xf32> to vector<8xf32>
    %119 = vector.shape_cast %118 : vector<8xf32> to vector<8x1xf32>
    %120 = vector.broadcast %119 : vector<8x1xf32> to vector<8x8xf32>
    %121 = arith.cmpf oeq, %117, %120 : vector<8x8xf32>
    %c8_i32_23 = arith.constant 8 : i32
    %122 = vector.broadcast %c8_i32_23 : i32 to vector<8x8xi32>
    %123 = arith.select %121, %38, %122 : vector<8x8xi1>, vector<8x8xi32>
    %cst_24 = arith.constant dense<2147483647> : vector<8xi32>
    %124 = vector.multi_reduction <minsi>, %123, %cst_24 [1] : vector<8x8xi32> to vector<8xi32>
    %125 = vector.shape_cast %124 : vector<8xi32> to vector<8x1xi32>
    %126 = vector.broadcast %125 : vector<8x1xi32> to vector<8x8xi32>
    %127 = arith.cmpi eq, %38, %126 : vector<8x8xi32>
    %128 = arith.ori %115, %127 : vector<8x8xi1>
    %129 = arith.extui %127 : vector<8x8xi1> to vector<8x8xi32>
    %130 = arith.sitofp %129 : vector<8x8xi32> to vector<8x8xf32>
    %131 = vector.shape_cast %130 : vector<8x8xf32> to vector<8x1x8xf32>
    "tpu.trace_start"() <{level = 10 : i32, message = "bqi,bij->bqj"}> : () -> ()
    %cst_25 = arith.constant dense<0.000000e+00> : vector<8x1x8xf32>
    %132 = tpu.matmul %131, %37, %cst_25 {dimension_numbers = #tpu.dot_dimension_numbers<[2], [1], [1], [2], [0, 0, 0, 1, 1, 2], [0], [0]>} : vector<8x1x8xf32>, vector<8x8x8xf32>, vector<8x1x8xf32> -> vector<8x1x8xf32>
    "tpu.trace_stop"() : () -> ()
    %133 = vector.shape_cast %132 : vector<8x1x8xf32> to vector<8x8xf32>
    %134 = arith.minimumf %112, %133 : vector<8x8xf32>
    %135 = arith.select %128, %112, %134 : vector<8x8xi1>, vector<8x8xf32>
    %136 = arith.extui %128 : vector<8x8xi1> to vector<8x8xi32>
    %c4_i32 = arith.constant 4 : i32
    %c0_i32_26 = arith.constant 0 : i32
    %137 = vector.broadcast %c0_i32_26 : i32 to vector<8x8xi32>
    %138 = arith.cmpi sgt, %136, %137 : vector<8x8xi32>
    %139 = vector.broadcast %cst_5 : f32 to vector<8x8xf32>
    %140 = arith.select %138, %139, %135 : vector<8x8xi1>, vector<8x8xf32>
    %cst_27 = arith.constant dense<0x7F800000> : vector<8xf32>
    %141 = vector.multi_reduction <minimumf>, %140, %cst_27 [1] : vector<8x8xf32> to vector<8xf32>
    %142 = vector.shape_cast %141 : vector<8xf32> to vector<8x1xf32>
    %143 = vector.broadcast %142 : vector<8x1xf32> to vector<8x8xf32>
    %144 = arith.cmpf oeq, %140, %143 : vector<8x8xf32>
    %c8_i32_28 = arith.constant 8 : i32
    %145 = vector.broadcast %c8_i32_28 : i32 to vector<8x8xi32>
    %146 = arith.select %144, %38, %145 : vector<8x8xi1>, vector<8x8xi32>
    %cst_29 = arith.constant dense<2147483647> : vector<8xi32>
    %147 = vector.multi_reduction <minsi>, %146, %cst_29 [1] : vector<8x8xi32> to vector<8xi32>
    %148 = vector.shape_cast %147 : vector<8xi32> to vector<8x1xi32>
    %149 = vector.broadcast %148 : vector<8x1xi32> to vector<8x8xi32>
    %150 = arith.cmpi eq, %38, %149 : vector<8x8xi32>
    %151 = arith.ori %138, %150 : vector<8x8xi1>
    %152 = arith.extui %150 : vector<8x8xi1> to vector<8x8xi32>
    %153 = arith.sitofp %152 : vector<8x8xi32> to vector<8x8xf32>
    %154 = vector.shape_cast %153 : vector<8x8xf32> to vector<8x1x8xf32>
    "tpu.trace_start"() <{level = 10 : i32, message = "bqi,bij->bqj"}> : () -> ()
    %cst_30 = arith.constant dense<0.000000e+00> : vector<8x1x8xf32>
    %155 = tpu.matmul %154, %37, %cst_30 {dimension_numbers = #tpu.dot_dimension_numbers<[2], [1], [1], [2], [0, 0, 0, 1, 1, 2], [0], [0]>} : vector<8x1x8xf32>, vector<8x8x8xf32>, vector<8x1x8xf32> -> vector<8x1x8xf32>
    "tpu.trace_stop"() : () -> ()
    %156 = vector.shape_cast %155 : vector<8x1x8xf32> to vector<8x8xf32>
    %157 = arith.minimumf %135, %156 : vector<8x8xf32>
    %158 = arith.select %151, %135, %157 : vector<8x8xi1>, vector<8x8xf32>
    %159 = arith.extui %151 : vector<8x8xi1> to vector<8x8xi32>
    %c5_i32 = arith.constant 5 : i32
    %c0_i32_31 = arith.constant 0 : i32
    %160 = vector.broadcast %c0_i32_31 : i32 to vector<8x8xi32>
    %161 = arith.cmpi sgt, %159, %160 : vector<8x8xi32>
    %162 = vector.broadcast %cst_5 : f32 to vector<8x8xf32>
    %163 = arith.select %161, %162, %158 : vector<8x8xi1>, vector<8x8xf32>
    %cst_32 = arith.constant dense<0x7F800000> : vector<8xf32>
    %164 = vector.multi_reduction <minimumf>, %163, %cst_32 [1] : vector<8x8xf32> to vector<8xf32>
    %165 = vector.shape_cast %164 : vector<8xf32> to vector<8x1xf32>
    %166 = vector.broadcast %165 : vector<8x1xf32> to vector<8x8xf32>
    %167 = arith.cmpf oeq, %163, %166 : vector<8x8xf32>
    %c8_i32_33 = arith.constant 8 : i32
    %168 = vector.broadcast %c8_i32_33 : i32 to vector<8x8xi32>
    %169 = arith.select %167, %38, %168 : vector<8x8xi1>, vector<8x8xi32>
    %cst_34 = arith.constant dense<2147483647> : vector<8xi32>
    %170 = vector.multi_reduction <minsi>, %169, %cst_34 [1] : vector<8x8xi32> to vector<8xi32>
    %171 = vector.shape_cast %170 : vector<8xi32> to vector<8x1xi32>
    %172 = vector.broadcast %171 : vector<8x1xi32> to vector<8x8xi32>
    %173 = arith.cmpi eq, %38, %172 : vector<8x8xi32>
    %174 = arith.ori %161, %173 : vector<8x8xi1>
    %175 = arith.extui %173 : vector<8x8xi1> to vector<8x8xi32>
    %176 = arith.sitofp %175 : vector<8x8xi32> to vector<8x8xf32>
    %177 = vector.shape_cast %176 : vector<8x8xf32> to vector<8x1x8xf32>
    "tpu.trace_start"() <{level = 10 : i32, message = "bqi,bij->bqj"}> : () -> ()
    %cst_35 = arith.constant dense<0.000000e+00> : vector<8x1x8xf32>
    %178 = tpu.matmul %177, %37, %cst_35 {dimension_numbers = #tpu.dot_dimension_numbers<[2], [1], [1], [2], [0, 0, 0, 1, 1, 2], [0], [0]>} : vector<8x1x8xf32>, vector<8x8x8xf32>, vector<8x1x8xf32> -> vector<8x1x8xf32>
    "tpu.trace_stop"() : () -> ()
    %179 = vector.shape_cast %178 : vector<8x1x8xf32> to vector<8x8xf32>
    %180 = arith.minimumf %158, %179 : vector<8x8xf32>
    %181 = arith.select %174, %158, %180 : vector<8x8xi1>, vector<8x8xf32>
    %182 = arith.extui %174 : vector<8x8xi1> to vector<8x8xi32>
    %c6_i32 = arith.constant 6 : i32
    %c0_i32_36 = arith.constant 0 : i32
    %183 = vector.broadcast %c0_i32_36 : i32 to vector<8x8xi32>
    %184 = arith.cmpi sgt, %182, %183 : vector<8x8xi32>
    %185 = vector.broadcast %cst_5 : f32 to vector<8x8xf32>
    %186 = arith.select %184, %185, %181 : vector<8x8xi1>, vector<8x8xf32>
    %cst_37 = arith.constant dense<0x7F800000> : vector<8xf32>
    %187 = vector.multi_reduction <minimumf>, %186, %cst_37 [1] : vector<8x8xf32> to vector<8xf32>
    %188 = vector.shape_cast %187 : vector<8xf32> to vector<8x1xf32>
    %189 = vector.broadcast %188 : vector<8x1xf32> to vector<8x8xf32>
    %190 = arith.cmpf oeq, %186, %189 : vector<8x8xf32>
    %c8_i32_38 = arith.constant 8 : i32
    %191 = vector.broadcast %c8_i32_38 : i32 to vector<8x8xi32>
    %192 = arith.select %190, %38, %191 : vector<8x8xi1>, vector<8x8xi32>
    %cst_39 = arith.constant dense<2147483647> : vector<8xi32>
    %193 = vector.multi_reduction <minsi>, %192, %cst_39 [1] : vector<8x8xi32> to vector<8xi32>
    %194 = vector.shape_cast %193 : vector<8xi32> to vector<8x1xi32>
    %195 = vector.broadcast %194 : vector<8x1xi32> to vector<8x8xi32>
    %196 = arith.cmpi eq, %38, %195 : vector<8x8xi32>
    %197 = arith.ori %184, %196 : vector<8x8xi1>
    %198 = arith.extui %196 : vector<8x8xi1> to vector<8x8xi32>
    %199 = arith.sitofp %198 : vector<8x8xi32> to vector<8x8xf32>
    %200 = vector.shape_cast %199 : vector<8x8xf32> to vector<8x1x8xf32>
    "tpu.trace_start"() <{level = 10 : i32, message = "bqi,bij->bqj"}> : () -> ()
    %cst_40 = arith.constant dense<0.000000e+00> : vector<8x1x8xf32>
    %201 = tpu.matmul %200, %37, %cst_40 {dimension_numbers = #tpu.dot_dimension_numbers<[2], [1], [1], [2], [0, 0, 0, 1, 1, 2], [0], [0]>} : vector<8x1x8xf32>, vector<8x8x8xf32>, vector<8x1x8xf32> -> vector<8x1x8xf32>
    "tpu.trace_stop"() : () -> ()
    %202 = vector.shape_cast %201 : vector<8x1x8xf32> to vector<8x8xf32>
    %203 = arith.minimumf %181, %202 : vector<8x8xf32>
    %204 = arith.select %197, %181, %203 : vector<8x8xi1>, vector<8x8xf32>
    %205 = arith.extui %197 : vector<8x8xi1> to vector<8x8xi32>
    %c7_i32 = arith.constant 7 : i32
    %c0_i32_41 = arith.constant 0 : i32
    %206 = vector.broadcast %c0_i32_41 : i32 to vector<8x8xi32>
    %207 = arith.cmpi sgt, %205, %206 : vector<8x8xi32>
    %208 = vector.broadcast %cst_5 : f32 to vector<8x8xf32>
    %209 = arith.select %207, %208, %204 : vector<8x8xi1>, vector<8x8xf32>
    %cst_42 = arith.constant dense<0x7F800000> : vector<8xf32>
    %210 = vector.multi_reduction <minimumf>, %209, %cst_42 [1] : vector<8x8xf32> to vector<8xf32>
    %211 = vector.shape_cast %210 : vector<8xf32> to vector<8x1xf32>
    %212 = vector.broadcast %211 : vector<8x1xf32> to vector<8x8xf32>
    %213 = arith.cmpf oeq, %209, %212 : vector<8x8xf32>
    %c8_i32_43 = arith.constant 8 : i32
    %214 = vector.broadcast %c8_i32_43 : i32 to vector<8x8xi32>
    %215 = arith.select %213, %38, %214 : vector<8x8xi1>, vector<8x8xi32>
    %cst_44 = arith.constant dense<2147483647> : vector<8xi32>
    %216 = vector.multi_reduction <minsi>, %215, %cst_44 [1] : vector<8x8xi32> to vector<8xi32>
    %217 = vector.shape_cast %216 : vector<8xi32> to vector<8x1xi32>
    %218 = vector.broadcast %217 : vector<8x1xi32> to vector<8x8xi32>
    %219 = arith.cmpi eq, %38, %218 : vector<8x8xi32>
    %220 = arith.ori %207, %219 : vector<8x8xi1>
    %221 = arith.extui %219 : vector<8x8xi1> to vector<8x8xi32>
    %222 = arith.sitofp %221 : vector<8x8xi32> to vector<8x8xf32>
    %223 = vector.shape_cast %222 : vector<8x8xf32> to vector<8x1x8xf32>
    "tpu.trace_start"() <{level = 10 : i32, message = "bqi,bij->bqj"}> : () -> ()
    %cst_45 = arith.constant dense<0.000000e+00> : vector<8x1x8xf32>
    %224 = tpu.matmul %223, %37, %cst_45 {dimension_numbers = #tpu.dot_dimension_numbers<[2], [1], [1], [2], [0, 0, 0, 1, 1, 2], [0], [0]>} : vector<8x1x8xf32>, vector<8x8x8xf32>, vector<8x1x8xf32> -> vector<8x1x8xf32>
    "tpu.trace_stop"() : () -> ()
    %225 = vector.shape_cast %224 : vector<8x1x8xf32> to vector<8x8xf32>
    %226 = arith.minimumf %204, %225 : vector<8x8xf32>
    %227 = arith.select %220, %204, %226 : vector<8x8xi1>, vector<8x8xf32>
    %228 = arith.extui %220 : vector<8x8xi1> to vector<8x8xi32>
    %229 = math.sqrt %227 : vector<8x8xf32>
    %230 = vector.shape_cast %229 : vector<8x8xf32> to vector<8x8x1xf32>
    %231 = vector.shape_cast %229 : vector<8x8xf32> to vector<8x1x8xf32>
    %232 = tpu.iota {dimensions = array<i32: 1>} : vector<8x8x8xi32>
    %233 = tpu.iota {dimensions = array<i32: 2>} : vector<8x8x8xi32>
    %234 = vector.broadcast %231 : vector<8x1x8xf32> to vector<8x8x8xf32>
    %235 = vector.broadcast %230 : vector<8x8x1xf32> to vector<8x8x8xf32>
    %236 = arith.cmpf olt, %234, %235 : vector<8x8x8xf32>
    %237 = vector.broadcast %231 : vector<8x1x8xf32> to vector<8x8x8xf32>
    %238 = vector.broadcast %230 : vector<8x8x1xf32> to vector<8x8x8xf32>
    %239 = arith.cmpf oeq, %237, %238 : vector<8x8x8xf32>
    %240 = arith.cmpi slt, %233, %232 : vector<8x8x8xi32>
    %241 = arith.andi %239, %240 : vector<8x8x8xi1>
    %242 = arith.ori %236, %241 : vector<8x8x8xi1>
    %243 = arith.extui %242 : vector<8x8x8xi1> to vector<8x8x8xi32>
    %cst_46 = arith.constant dense<0> : vector<8x8xi32>
    %244 = vector.multi_reduction <add>, %243, %cst_46 [2] : vector<8x8x8xi32> to vector<8x8xi32>
    %c0_i32_47 = arith.constant 0 : i32
    %245 = vector.broadcast %c0_i32_47 : i32 to vector<8x8xi32>
    %246 = arith.cmpi eq, %244, %245 : vector<8x8xi32>
    %c1_i32_48 = arith.constant 1 : i32
    %247 = vector.broadcast %c1_i32_48 : i32 to vector<8x8xi32>
    %248 = arith.subi %244, %247 : vector<8x8xi32>
    %c7_i32_49 = arith.constant 7 : i32
    %249 = vector.broadcast %c7_i32_49 : i32 to vector<8x8xi32>
    %250 = arith.select %246, %249, %248 : vector<8x8xi1>, vector<8x8xi32>
    %251 = vector.shape_cast %250 : vector<8x8xi32> to vector<8x8x1xi32>
    %252 = vector.broadcast %251 : vector<8x8x1xi32> to vector<8x8x8xi32>
    %253 = arith.cmpi eq, %252, %233 : vector<8x8x8xi32>
    %254 = arith.extui %253 : vector<8x8x8xi1> to vector<8x8x8xi32>
    %255 = arith.sitofp %254 : vector<8x8x8xi32> to vector<8x8x8xf32>
    %256 = vector.shape_cast %229 : vector<8x8xf32> to vector<8x1x8xf32>
    "tpu.trace_start"() <{level = 10 : i32, message = "bqi,bip->bqp"}> : () -> ()
    %cst_50 = arith.constant dense<0.000000e+00> : vector<8x1x8xf32>
    %257 = tpu.matmul %256, %255, %cst_50 {dimension_numbers = #tpu.dot_dimension_numbers<[2], [1], [1], [2], [0, 0, 0, 1, 1, 2], [0], [0]>} : vector<8x1x8xf32>, vector<8x8x8xf32>, vector<8x1x8xf32> -> vector<8x1x8xf32>
    "tpu.trace_stop"() : () -> ()
    %258 = vector.shape_cast %257 : vector<8x1x8xf32> to vector<8x8xf32>
    %c0_51 = arith.constant 0 : index
    %c0_52 = arith.constant 0 : index
    %259 = vector.load %arg2[%c0_51, %c0_52] : memref<8x8xf32, #tpu.memory_space<vmem>>, vector<8x8xf32>
    tpu.vector_store %arg2[%c0_51, %c0_52], %258 {strides = array<i32>} : memref<8x8xf32, #tpu.memory_space<vmem>>, vector<8x8xf32>,
    return
  }
  func.func @transform_0(%arg0: i32) -> (i32, i32, i32) {
    %c0_i32 = arith.constant 0 : i32
    %c0_i32_0 = arith.constant 0 : i32
    %c0_i32_1 = arith.constant 0 : i32
    return %arg0, %c0_i32, %c0_i32_0 : i32, i32, i32
  }
  func.func @transform_1(%arg0: i32) -> (i32, i32) {
    %c0_i32 = arith.constant 0 : i32
    %c0_i32_0 = arith.constant 0 : i32
    return %arg0, %c0_i32 : i32, i32
  }
}

</mosaic_0001>

<bundles_post_ra>
// kernel: tpu_custom_call.1
= control target key start
LH: loop header
LB: loop body
LE: loop exit
PB: predicated region body
PF: predicated region fallthrough
CT: control target
= control target key end

     0   :  { %v57_v0 = vlaneseq  ;;  %s8679_s0 = inlined_call_operand.vmem [shape: f32[8,8,4], index: 0, kind: input, shape index: {}]   ;;  %s8680_s1 = inlined_call_operand.hbm [shape: f32[8,8], index: 1, kind: output, shape index: {}]  }
   0x1   :  { %v7684_v1 = vld [vmem:[%s8679_s0] sm:$0xff] }
   0x2   :  { %6 = vsyncpa [#allocation3], 0  ;;  %v7687_v2 = vand.u32 127, %v57_v0  ;;  %v7661_v3 = vmov 0   ;;  %v7662_v4 = vmov 1   ;;  %vm612_vm0 = vcmask 64512  }
   0x3   :  { %7612 = vset.pattern.permute.xlu1 %v7661_v3  ;;  %7613 = vset.pattern.permute.xlu0 %v7662_v4  ;;  %v10_v5 = vld [vmem:[%s8679_s0 + $0x8] sm:$0xff]  ;;  %v7663_v6 = vmov inf   ;;  %v7664_v9 = vmov 2   ;;  %v7704_v10 = vld [vmem:[%s8679_s0 + $0x10] sm:$0xff]  ;;  %v7665_v11 = vmov 3   ;;  %v7714_v12 = vld [vmem:[%s8679_s0 + $0x18] sm:$0xff] }
   0x4   :  { %19 = vperm.xlu1 %7612, %v7684_v1   ;;  %vm610_vm1 = vcmp.eq.s32.totalorder %v7687_v2, 0  ;;  %v7724_v13 = vld [vmem:[%s8679_s0 + $0x20] sm:$0xff]  ;;  %v7733_v14 = vld [vmem:[%s8679_s0 + $0x28] sm:$0xff]  ;;  %v7744_v15 = vld [vmem:[%s8679_s0 + $0x30] sm:$0xff]  ;;  %v7767_v21 = vshrl.u32 %v57_v0, 7  ;;  %v7666_v51 = vmov 0.0  }
   0x5   :  { %v7695_v7 = vsel %vm610_vm1, 0.0, %v7663_v6  ;;  %v7753_v16 = vld [vmem:[%s8679_s0 + $0x38] sm:$0xff]  ;;  %7247 = vmatprep.subr.mxu1 %v7666_v51  ;;  %7242 = vmatprep.subr.mxu0 %v7666_v51  ;;  %vm7667_vm4 = vmmov 0   ;;  %vm91_vm6 = vcmask 1041409   ;;  %vm92_vm7 = vcmask 1042434   ;;  %s7670_s0 = smov [#allocation2]  }
   0x6   :  { %v613_v8 = vsel %vm612_vm0, %v7695_v7, inf  ;;  %v7774_v26 = vsub.s32 %v7687_v2, %v7767_v21  ;;  %7244 = vmatprep.mubr.msk.f32.mxu0 %vm7667_vm4, %v7666_v51  ;;  %7249 = vmatprep.mubr.msk.f32.mxu1 %vm7667_vm4, %v7666_v51  ;;  %vm94_vm8 = vcmask 1043459   ;;  %vm8684_vm9 = vcmask 1044484   ;;  %s6986_s22 = sshll.u32 %s7670_s0, 4  ;;  %s6987_s22 = int_to_ptr.vmem [resolvable:$true] %s6986_s22 }
   0x7   :  { %614 = vmin.xlane.f32.xlu0 %v613_v8  ;;  %vm8683_vm10 = vcmask 1045509   ;;  %vm8682_vm11 = vcmask 1046534   ;;  %vm8681_vm12 = vcmask 1047559   ;;  %s7637_s23 = scalar_lea.vmem %s6987_s22, 128  ;;  %p7642_p1 = scmp.lt.s32.totalorder %s6987_s22, %s6987_s22 }
   0x8   :  { %24 = vperm.xlu1 %7612, %v10_v5   ;;  %p7638_p0 = scmp.ne.s32.totalorder %s6987_s22, %s7637_s23  ;;  %p7643_p2 = scmp.lt.s32.totalorder %s7637_s23, %s7637_s23 }
   0xa   :  { %p7644_p3 = por %p7643_p2, %p7642_p1 }
   0xc   :  { %7614 = vset.pattern.permute.xlu1 %v7662_v4  ;;  %p7645_p4 = pnand %p7644_p3, %p7638_p0 }
   0xd   :  { %183 = vperm.xlu1 %7614, %v10_v5  }
  0x11   :  { %7615 = vset.pattern.permute.xlu1 %v7664_v9 }
  0x12   :  { %323 = vperm.xlu1 %7615, %v7684_v1  }
  0x16   :  { %327 = vperm.xlu1 %7615, %v10_v5  }
  0x1a   :  { %7616 = vset.pattern.permute.xlu1 %v7661_v3 }
  0x1b   :  { %29 = vperm.xlu1 %7616, %v7704_v10  }
  0x1f   :  { %7617 = vset.pattern.permute.xlu1 %v7662_v4 }
  0x20   :  { %187 = vperm.xlu1 %7617, %v7704_v10  }
  0x24   :  { %7618 = vset.pattern.permute.xlu1 %v7665_v11 }
  0x25   :  { %467 = vperm.xlu1 %7618, %v7684_v1  }
  0x29   :  { %7619 = vset.pattern.permute.xlu1 %v7661_v3 }
  0x2a   :  { %34 = vperm.xlu1 %7619, %v7714_v12  }
  0x2e   :  { %7620 = vset.pattern.permute.xlu1 %v7665_v11 }
  0x2f   :  { %471 = vperm.xlu1 %7620, %v10_v5  }
  0x33   :  { %7621 = vset.pattern.permute.xlu1 %v7664_v9 }
  0x34   :  { %335 = vperm.xlu1 %7621, %v7714_v12  }
  0x38   :  { %7622 = vset.pattern.permute.xlu1 %v7661_v3 }
  0x39   :  { %39 = vperm.xlu1 %7622, %v7724_v13  }
  0x3d   :  { %7623 = vset.pattern.permute.xlu1 %v7665_v11 }
  0x3e   :  { %475 = vperm.xlu1 %7623, %v7704_v10  }
  0x42   :  { %7624 = vset.pattern.permute.xlu1 %v7661_v3 }
  0x43   :  { %44 = vperm.xlu1 %7624, %v7733_v14  }
  0x47   :  { %7625 = vset.pattern.permute.xlu1 %v7665_v11 }
  0x48   :  { %479 = vperm.xlu1 %7625, %v7714_v12  }
  0x4c   :  { %7626 = vset.pattern.permute.xlu1 %v7664_v9 }
  0x4d   :  { %343 = vperm.xlu1 %7626, %v7733_v14  }
  0x51   :  { %7627 = vset.pattern.permute.xlu1 %v7661_v3 }
  0x52   :  { %49 = vperm.xlu1 %7627, %v7744_v15  }
  0x56   :  { %7628 = vset.pattern.permute.xlu1 %v7665_v11 }
  0x57   :  { %483 = vperm.xlu1 %7628, %v7724_v13  }
  0x5b   :  { %7629 = vset.pattern.permute.xlu1 %v7661_v3 }
  0x5c   :  { %54 = vperm.xlu1 %7629, %v7753_v16  }
  0x60   :  { %7631 = vset.pattern.permute.xlu1 %v7665_v11 }
  0x61   :  { %487 = vperm.xlu1 %7631, %v7733_v14  }
  0x65   :  { %7632 = vset.pattern.permute.xlu1 %v7664_v9 }
  0x66   :  { %351 = vperm.xlu1 %7632, %v7753_v16  }
  0x6a   :  { %7633 = vset.pattern.permute.xlu1 %v7665_v11 }
  0x83   :  { %v7762_v17 = vpop.permute.xlu1 %19 }
  0x84   :  { %v62_v61 = vrot.slane %v7762_v17, %v7774_v26 }
  0x87   :  { %v25_v18 = vpop.permute.xlu1 %24 }
  0x88   :  { %v66_v34 = vrot.slane %v25_v18, %v7774_v26 }
  0x8a   :  { %v155_v40 = vsub.f32 %v25_v18, %v66_v34 }
  0x8c   :  { %v184_v19 = vpop.permute.xlu1 %183  ;;  %v163_v44 = vmul.f32 %v155_v40, %v155_v40 }
  0x8d   :  { %v217_v35 = vrot.slane %v184_v19, %v7774_v26 }
  0x8f   :  { %v299_v41 = vsub.f32 %v184_v19, %v217_v35 }
  0x91   :  { %v7764_v20 = vpop.permute.xlu1 %323  ;;  %v307_v45 = vmul.f32 %v299_v41, %v299_v41 }
  0x92   :  { %v357_v62 = vrot.slane %v7764_v20, %v7774_v26 }
  0x93   :  { %v315_v48 = vadd.f32 %v307_v45, %v163_v44 }
  0x94   :  { %v615_v22 = vpop.xlane.xlu0 %614  ;;  %v442_v5 = vsub.f32 %v7764_v20, %v357_v62 }
  0x95   :  { %v328_v23 = vpop.permute.xlu1 %327  ;;  %vm616_vm2 = vcmp.eq.f32.partialorder %v7695_v7, %v615_v22 }
  0x96   :  { %v617_v24 = vsel %vm616_vm2, %v7687_v2, 8  ;;  %v361_v42 = vrot.slane %v328_v23, %v7774_v26 }
  0x97   :  { %v618_v25 = vsel %vm612_vm0, %v617_v24, 2147483647 }
  0x98   :  { %v620_v27 = vshra.s32 %v618_v25, 16  ;;  %v443_v46 = vsub.f32 %v328_v23, %v361_v42  ;;  %v619_v57 = vand.u32 65535, %v618_v25 }
  0x9a   :  { %v30_v28 = vpop.permute.xlu1 %29  ;;  %v622_v29 = vcvt.s32.f32 %v620_v27  ;;  %v451_v49 = vmul.f32 %v443_v46, %v443_v46  ;;  %v621_v59 = vcvt.s32.f32 %v619_v57 }
  0x9b   :  { %v70_v30 = vrot.slane %v30_v28, %v7774_v26 }
  0x9c   :  { %623 = vmin.xlane.f32.xlu0 %v622_v29  ;;  %v459_v53 = vadd.f32 %v451_v49, %v315_v48 }
  0x9d   :  { %v156_v31 = vsub.f32 %v30_v28, %v70_v30 }
  0x9f   :  { %v188_v32 = vpop.permute.xlu1 %187  ;;  %v164_v36 = vmul.f32 %v156_v31, %v156_v31 }
  0xa0   :  { %v221_v33 = vrot.slane %v188_v32, %v7774_v26 }
  0xa2   :  { %v300_v37 = vsub.f32 %v188_v32, %v221_v33  ;;  %v7668_v32 = vmov 1966171168  }
  0xa3   :  { %v639_v33 = vunpack.c.l.s4 %v7668_v32 }
  0xa4   :  { %v308_v38 = vmul.f32 %v300_v37, %v300_v37  ;;  %v468_v39 = vpop.permute.xlu1 %467 }
  0xa5   :  { %v501_v63 = vrot.slane %v468_v39, %v7774_v26  ;;  %v640_v40 = vunpack.c.0.s8 %v639_v33 }
  0xa6   :  { %v7781_v43 = vadd.f32 %v308_v38, %v164_v36 }
  0xa7   :  { %v586_v6 = vsub.f32 %v468_v39, %v501_v63 }
  0xa9   :  { %v7783_v47 = vpop.permute.xlu1 %34 }
  0xaa   :  { %v74_v34 = vrot.slane %v7783_v47, %v7774_v26 }
  0xac   :  { %v157_v44 = vsub.f32 %v7783_v47, %v74_v34 }
  0xae   :  { %v472_v50 = vpop.permute.xlu1 %471  ;;  %v165_v63 = vmul.f32 %v157_v44, %v157_v44 }
  0xaf   :  { %v505_v52 = vrot.slane %v472_v50, %v7774_v26 }
  0xb1   :  { %v587_v54 = vsub.f32 %v472_v50, %v505_v52 }
  0xb2   :  { %179 = vperm.xlu0 %7613, %v7684_v1   ;;  %v154_v1 = vsub.f32 %v7762_v17, %v62_v61 }
  0xb3   :  { %v595_v55 = vmul.f32 %v587_v54, %v587_v54  ;;  %v336_v17 = vpop.permute.xlu1 %335 }
  0xb4   :  { %v369_v35 = vrot.slane %v336_v17, %v7774_v26 }
  0xb5   :  { %v7789_v56 = vadd.f32 %v595_v55, %v459_v53 }
  0xb6   :  { %191 = vperm.xlu0 %7613, %v7714_v12   ;;  %v594_v12 = vmul.f32 %v586_v6, %v586_v6  ;;  %v445_v45 = vsub.f32 %v336_v17, %v369_v35 }
  0xb7   :  { %7248 = vmatpush3.msra.mxu1 %v7789_v56 }
  0xb8   :  { %7257 = vmatprep.subr.mxu1 %v7666_v51  ;;  %v40_v18 = vpop.permute.xlu1 %39 }
  0xb9   :  { %v78_v36 = vrot.slane %v40_v18, %v7774_v26 }
  0xba   :  { %195 = vperm.xlu0 %7613, %v7724_v13  }
  0xbb   :  { %v158_v46 = vsub.f32 %v40_v18, %v78_v36 }
  0xbd   :  { %v476_v19 = vpop.permute.xlu1 %475 }
  0xbe   :  { %199 = vperm.xlu0 %7613, %v7733_v14   ;;  %v509_v37 = vrot.slane %v476_v19, %v7774_v26 }
  0xc0   :  { %v588_v48 = vsub.f32 %v476_v19, %v509_v37 }
  0xc2   :  { %203 = vperm.xlu0 %7613, %v7744_v15   ;;  %v45_v20 = vpop.permute.xlu1 %44 }
  0xc3   :  { %v82_v39 = vrot.slane %v45_v20, %v7774_v26 }
  0xc5   :  { %v159_v53 = vsub.f32 %v45_v20, %v82_v39 }
  0xc6   :  { %207 = vperm.xlu0 %7613, %v7753_v16  }
  0xc7   :  { %v480_v23 = vpop.permute.xlu1 %479 }
  0xc8   :  { %v513_v42 = vrot.slane %v480_v23, %v7774_v26 }
  0xca   :  { %7630 = vset.pattern.permute.xlu0 %v7664_v9  ;;  %v162_v9 = vmul.f32 %v154_v1, %v154_v1  ;;  %v589_v47 = vsub.f32 %v480_v23, %v513_v42  ;;  %v166_v1 = vmul.f32 %v158_v46, %v158_v46 }
  0xcb   :  { %331 = vperm.xlu0 %7630, %v7704_v10  }
  0xcc   :  { %v344_v25 = vpop.permute.xlu1 %343  ;;  %v597_v19 = vmul.f32 %v589_v47, %v589_v47 }
  0xcd   :  { %v377_v55 = vrot.slane %v344_v25, %v7774_v26 }
  0xcf   :  { %339 = vperm.xlu0 %7630, %v7724_v13  }
  0xd1   :  { %v50_v27 = vpop.permute.xlu1 %49 }
  0xd2   :  { %v86_v57 = vrot.slane %v50_v27, %v7774_v26 }
  0xd3   :  { %347 = vperm.xlu0 %7630, %v7744_v15  }
  0xd7   :  { %7634 = vset.pattern.permute.xlu0 %v7665_v11  ;;  %v450_v11 = vmul.f32 %v442_v5, %v442_v5 }
  0xd8   :  { %495 = vperm.xlu0 %7634, %v7753_v16  }
 0x129   :  { %v7804_v58 = vpop.xlane.xlu0 %623 }
 0x12a   :  { %vm625_vm3 = vcmp.eq.f32.partialorder %v622_v29, %v7804_v58  ;;  %v484_v29 = vpop.permute.xlu1 %483  ;;  %v630_v6 = vcvt.f32.s32 %v7804_v58 }
 0x12b   :  { %v626_v60 = vsel %vm625_vm3, %v621_v59, inf  ;;  %v7844_v59 = vsub.s32 %v640_v40, %v7767_v21  ;;  %v517_v62 = vrot.slane %v484_v29, %v7774_v26 }
 0x12c   :  { %627 = vmin.xlane.f32.xlu1 %v626_v60 }
 0x12d   :  { %v590_v20 = vsub.f32 %v484_v29, %v517_v62 }
 0x12e   :  { %v7828_v31 = vpop.permute.xlu1 %54 }
 0x12f   :  { %v90_v58 = vrot.slane %v7828_v31, %v7774_v26  ;;  %v598_v40 = vmul.f32 %v590_v20, %v590_v20 }
 0x131   :  { %v180_v0 = vpop.permute.xlu0 %179  ;;  %v161_v44 = vsub.f32 %v7828_v31, %v90_v58 }
 0x132   :  { %v213_v4 = vrot.slane %v180_v0, %v7774_v26  ;;  %v488_v49 = vpop.permute.xlu1 %487 }
 0x133   :  { %v521_v23 = vrot.slane %v488_v49, %v7774_v26  ;;  %v169_v62 = vmul.f32 %v161_v44, %v161_v44 }
 0x134   :  { %v298_v8 = vsub.f32 %v180_v0, %v213_v4  ;;  %v453_v0 = vmul.f32 %v445_v45, %v445_v45  ;;  %v596_v4 = vmul.f32 %v588_v48, %v588_v48 }
 0x135   :  { %v192_v22 = vpop.permute.xlu0 %191  ;;  %v591_v45 = vsub.f32 %v488_v49, %v521_v23 }
 0x136   :  { %v306_v10 = vmul.f32 %v298_v8, %v298_v8  ;;  %v225_v38 = vrot.slane %v192_v22, %v7774_v26  ;;  %v352_v5 = vpop.permute.xlu1 %351 }
 0x138   :  { %v314_v13 = vadd.f32 %v306_v10, %v162_v9  ;;  %v301_v50 = vsub.f32 %v192_v22, %v225_v38  ;;  %v167_v10 = vmul.f32 %v159_v53, %v159_v53 }
 0x139   :  { %v196_v24 = vpop.permute.xlu0 %195 }
 0x13a   :  { %v458_v14 = vadd.f32 %v450_v11, %v314_v13  ;;  %v229_v52 = vrot.slane %v196_v24, %v7774_v26  ;;  %v309_v8 = vmul.f32 %v301_v50, %v301_v50  ;;  %v160_v13 = vsub.f32 %v50_v27, %v86_v57 }
 0x13b   :  { %v631_v27 = vshll.u32 %v630_v6, 16 }
 0x13c   :  { %v7815_v16 = vadd.f32 %v594_v12, %v458_v14  ;;  %v302_v9 = vsub.f32 %v196_v24, %v229_v52  ;;  %v447_v12 = vsub.f32 %v344_v25, %v377_v55  ;;  %v385_v24 = vrot.slane %v352_v5, %v7774_v26 }
 0x13d   :  { %491 = vperm.xlu1 %7633, %v7744_v15   ;;  %v200_v15 = vpop.permute.xlu0 %199  ;;  %v317_v32 = vadd.f32 %v309_v8, %v165_v63  ;;  %v168_v37 = vmul.f32 %v160_v13, %v160_v13 }
 0x13e   :  { %7243 = vmatpush3.msra.mxu0 %v7815_v16  ;;  %v233_v60 = vrot.slane %v200_v15, %v7774_v26  ;;  %v310_v33 = vmul.f32 %v302_v9, %v302_v9  ;;  %v455_v36 = vmul.f32 %v447_v12, %v447_v12  ;;  %v449_v53 = vsub.f32 %v352_v5, %v385_v24 }
 0x13f   :  { %7252 = vmatprep.subr.mxu0 %v7666_v51  ;;  %v461_v50 = vadd.f32 %v453_v0, %v317_v32 }
 0x140   :  { %v303_v17 = vsub.f32 %v200_v15, %v233_v60  ;;  %v318_v52 = vadd.f32 %v310_v33, %v166_v1  ;;  %v599_v1 = vmul.f32 %v591_v45, %v591_v45 }
 0x141   :  { %v7824_v28 = vpop.permute.xlu0 %203  ;;  %v7877_v9 = vadd.f32 %v597_v19, %v461_v50 }
 0x142   :  { %v237_v18 = vrot.slane %v7824_v28, %v7774_v26  ;;  %v311_v38 = vmul.f32 %v303_v17, %v303_v17 }
 0x144   :  { %v304_v39 = vsub.f32 %v7824_v28, %v237_v18  ;;  %v319_v57 = vadd.f32 %v311_v38, %v167_v10 }
 0x145   :  { %v7826_v30 = vpop.permute.xlu0 %207 }
 0x146   :  { %v241_v22 = vrot.slane %v7826_v30, %v7774_v26  ;;  %v312_v49 = vmul.f32 %v304_v39, %v304_v39  ;;  %v463_v10 = vadd.f32 %v455_v36, %v319_v57 }
 0x148   :  { %v305_v42 = vsub.f32 %v7826_v30, %v241_v22  ;;  %v320_v13 = vadd.f32 %v312_v49, %v168_v37  ;;  %v7892_v58 = vadd.f32 %v599_v1, %v463_v10 }
 0x14a   :  { %v332_v41 = vpop.permute.xlu0 %331 }
 0x14b   :  { %v365_v54 = vrot.slane %v332_v41, %v7774_v26 }
 0x14d   :  { %v444_v11 = vsub.f32 %v332_v41, %v365_v54 }
 0x14e   :  { %v340_v61 = vpop.permute.xlu0 %339 }
 0x14f   :  { %v373_v14 = vrot.slane %v340_v61, %v7774_v26  ;;  %v452_v35 = vmul.f32 %v444_v11, %v444_v11 }
 0x151   :  { %v446_v29 = vsub.f32 %v340_v61, %v373_v14  ;;  %v460_v28 = vadd.f32 %v452_v35, %v7781_v43  ;;  %v313_v61 = vmul.f32 %v305_v42, %v305_v42  ;;  %v457_v43 = vmul.f32 %v449_v53, %v449_v53 }
 0x152   :  { %v348_v15 = vpop.permute.xlu0 %347 }
 0x153   :  { %v381_v46 = vrot.slane %v348_v15, %v7774_v26  ;;  %v454_v55 = vmul.f32 %v446_v29, %v446_v29  ;;  %v7875_v8 = vadd.f32 %v596_v4, %v460_v28 }
 0x155   :  { %v448_v63 = vsub.f32 %v348_v15, %v381_v46  ;;  %v462_v11 = vadd.f32 %v454_v55, %v318_v52 }
 0x157   :  { %v496_v54 = vpop.permute.xlu0 %495  ;;  %v456_v18 = vmul.f32 %v448_v63, %v448_v63  ;;  %v7887_v19 = vadd.f32 %v598_v40, %v462_v11 }
 0x158   :  { %v529_v0 = vrot.slane %v496_v54, %v7774_v26 }
 0x15a   :  { %v593_v20 = vsub.f32 %v496_v54, %v529_v0 }
 0x15c   :  { %v601_v32 = vmul.f32 %v593_v20, %v593_v20 }
 0x1b9   :  { %v628_v25 = vpop.xlane.xlu1 %627 }
 0x1ba   :  { %v629_v34 = vcvt.f32.s32 %v628_v25  ;;  %v464_v25 = vadd.f32 %v456_v18, %v320_v13 }
 0x1bc   :  { %v7859_v41 = vadd.s32 %v631_v27, %v629_v34 }
 0x1bd   :  { %v492_v48 = vpop.permute.xlu1 %491 }
 0x1be   :  { %vm633_vm5 = vcmp.eq.s32.totalorder %v7687_v2, %v7859_v41  ;;  %v525_v31 = vrot.slane %v492_v48, %v7774_v26  ;;  %v321_v26 = vadd.f32 %v313_v61, %v169_v62 }
 0x1bf   :  { %v6994_v30 = vsel %vm633_vm5, 1.0, %v7666_v51 }
 0x1c0   :  { %v637_v60 = vcombine.high %v6994_v30, %v6994_v30  ;;  %v644_v47 = vrot.slane %v6994_v30, %v7844_v59  ;;  %v592_v12 = vsub.f32 %v492_v48, %v525_v31  ;;  %v465_v27 = vadd.f32 %v457_v43, %v321_v26 }
 0x1c2   :  { %v660_v5 = vrot.slane %v644_v47, %v7844_v59  ;;  %v652_v6 = vcombine.high %v644_v47, %v644_v47  ;;  %v651_v14 = vrot.slane %v637_v60, %v7844_v59  ;;  %v600_v22 = vmul.f32 %v592_v12, %v592_v12 }
 0x1c3   :  { %v7910_v35 = vadd.f32 %v601_v32, %v465_v27 }
 0x1c4   :  { %7245 = vmatmul.mubr.msk.f32.vlgmr.msra.gmra.mrb[0].mxu0 %vm612_vm0, %v660_v5  ;;  %v674_v17 = vrot.slane %v652_v6, %v7844_v59  ;;  %v682_v4 = vcombine.high %v660_v5, %v660_v5  ;;  %v653_v23 = vcombine.high %v651_v14, %v651_v14  ;;  %v667_v33 = vrot.slane %v651_v14, %v7844_v59 }
 0x1c5   :  { %7253 = vmatpush3.msra.mxu0 %v7875_v8  ;;  %7254 = vmatprep.mubr.msk.f32.mxu0 %vm7667_vm4, %v7666_v51  ;;  %v7902_v15 = vadd.f32 %v600_v22, %v464_v25 }
 0x1c6   :  { %7250 = vmatmul.mubr.msk.f32.vlgmr.msra.gmra.mrb[0].mxu1 %vm612_vm0, %v674_v17  ;;  %7262 = vmatprep.subr.mxu0 %v7666_v51  ;;  %v684_v24 = vcombine.high %v674_v17, %v674_v17  ;;  %v681_v34 = vrot.slane %v653_v23, %v7844_v59  ;;  %v683_v36 = vcombine.high %v667_v33, %v667_v33 }
 0x1c7   :  { %7258 = vmatpush3.msra.mxu1 %v7877_v9  ;;  %7259 = vmatprep.mubr.msk.f32.mxu1 %vm7667_vm4, %v7666_v51 }
 0x1c8   :  { %7255 = vmatmul.mubr.msk.f32.vlgmr.msra.gmra.mrb[2].mxu0 %vm612_vm0, %v682_v4  ;;  %7267 = vmatprep.subr.mxu1 %v7666_v51  ;;  %v685_v37 = vcombine.high %v681_v34, %v681_v34 }
 0x1c9   :  { %7263 = vmatpush3.msra.mxu0 %v7887_v19  ;;  %7264 = vmatprep.mubr.msk.f32.mxu0 %vm7667_vm4, %v7666_v51 }
 0x1ca   :  { %7260 = vmatmul.mubr.msk.f32.vlgmr.msra.gmra.mrb[2].mxu1 %vm612_vm0, %v684_v24  ;;  %7272 = vmatprep.subr.mxu0 %v7666_v51 }
 0x1cb   :  { %7268 = vmatpush3.msra.mxu1 %v7892_v58  ;;  %7269 = vmatprep.mubr.msk.f32.mxu1 %vm7667_vm4, %v7666_v51 }
 0x1cc   :  { %7265 = vmatmul.mubr.msk.f32.vlgmr.msra.gmra.mrb[4].mxu0 %vm612_vm0, %v667_v33  ;;  %7277 = vmatprep.subr.mxu1 %v7666_v51 }
 0x1cd   :  { %7273 = vmatpush3.msra.mxu0 %v7902_v15  ;;  %7274 = vmatprep.mubr.msk.f32.mxu0 %vm7667_vm4, %v7666_v51 }
 0x1ce   :  { %7270 = vmatmul.mubr.msk.f32.vlgmr.msra.gmra.mrb[4].mxu1 %vm612_vm0, %v681_v34  ;;  %7282 = vmatprep.subr.mxu0 %v7666_v51 }
 0x1cf   :  { %7278 = vmatpush3.msra.mxu1 %v7910_v35  ;;  %7279 = vmatprep.mubr.msk.f32.mxu1 %vm7667_vm4, %v7666_v51 }
 0x1d0   :  { %7275 = vmatmul.mubr.msk.f32.vlgmr.msra.gmra.mrb[6].mxu0 %vm612_vm0, %v683_v36  ;;  %7287 = vmatprep.subr.mxu1 %v7666_v51 }
 0x1d1   :  { %7283 = vmatpush3.msra.mxu0 %v7815_v16  ;;  %7284 = vmatprep.mubr.msk.f32.mxu0 %vm7667_vm4, %v7666_v51 }
 0x1d2   :  { %7280 = vmatmul.mubr.msk.f32.vlgmr.msra.gmra.mrb[6].mxu1 %vm612_vm0, %v685_v37  ;;  %7292 = vmatprep.subr.mxu0 %v7666_v51 }
 0x1d3   :  { %7288 = vmatpush3.msra.mxu1 %v7789_v56  ;;  %7289 = vmatprep.mubr.msk.f32.mxu1 %vm7667_vm4, %v7666_v51 }
 0x1d4   :  { %7297 = vmatprep.subr.mxu1 %v7666_v51 }
 0x297   :  { %v754_v29 = vpop.f32.mrb[0].mxu0 }
 0x298   :  { %v7246_v38 = vpop.f32.mrb[1].mxu0 }
 0x299   :  { %v826_v39 = vpop.f32.mrb[0].mxu1 }
 0x29a   :  { %v1270_v40 = vrot.slane %v826_v39, 7  ;;  %v7251_v42 = vpop.f32.mrb[1].mxu1 }
 0x29b   :  { %v898_v44 = vpop.f32.mrb[2].mxu0 }
 0x29c   :  { %v1271_v45 = vsel %vm91_vm6, %v1270_v40, %v754_v29  ;;  %v1272_v46 = vrot.slane %v898_v44, 6  ;;  %v7256_v48 = vpop.f32.mrb[3].mxu0 }
 0x29d   :  { %v970_v50 = vpop.f32.mrb[2].mxu1 }
 0x29e   :  { %v1273_v52 = vsel %vm92_vm7, %v1272_v46, %v1271_v45  ;;  %v1274_v53 = vrot.slane %v970_v50, 5  ;;  %v7261_v54 = vpop.f32.mrb[3].mxu1 }
 0x29f   :  { %v1042_v28 = vpop.f32.mrb[4].mxu0 }
 0x2a0   :  { %v1275_v55 = vsel %vm94_vm8, %v1274_v53, %v1273_v52  ;;  %v1276_v30 = vrot.slane %v1042_v28, 4  ;;  %v7266_v31 = vpop.f32.mrb[5].mxu0 }
 0x2a1   :  { %v1114_v49 = vpop.f32.mrb[4].mxu1 }
 0x2a2   :  { %v1277_v57 = vsel %vm8684_vm9, %v1276_v30, %v1275_v55  ;;  %v1278_v60 = vrot.slane %v1114_v49, 3  ;;  %v7271_v47 = vpop.f32.mrb[5].mxu1 }
 0x2a3   :  { %v1186_v61 = vpop.f32.mrb[6].mxu0 }
 0x2a4   :  { %v1279_v62 = vsel %vm8683_vm10, %v1278_v60, %v1277_v57  ;;  %v1280_v63 = vrot.slane %v1186_v61, 2  ;;  %v7276_v0 = vpop.f32.mrb[7].mxu0 }
 0x2a5   :  { %v1258_v1 = vpop.f32.mrb[6].mxu1 }
 0x2a6   :  { %v1281_v43 = vsel %vm8682_vm11, %v1280_v63, %v1279_v62  ;;  %v1282_v5 = vrot.slane %v1258_v1, 1  ;;  %v7281_v6 = vpop.f32.mrb[7].mxu1 }
 0x2a8   :  { %v1283_v11 = vsel %vm8681_vm12, %v1282_v5, %v1281_v43 }
 0x2a9   :  { %v1285_v12 = vmin.f32 %v7695_v7, %v1283_v11 }
 0x2ab   :  { %v7943_v10 = vsel %vm633_vm5, %v7695_v7, %v1285_v12 }
 0x2ac   :  { %v1288_v13 = vsel %vm633_vm5, inf, %v7943_v10 }
 0x2ad   :  { %v1289_v14 = vsel %vm612_vm0, %v1288_v13, inf }
 0x2ae   :  { %1290 = vmin.xlane.f32.xlu1 %v1289_v14 }
 0x33b   :  { %v1291_v17 = vpop.xlane.xlu1 %1290 }
 0x33c   :  { %vm1292_vm13 = vcmp.eq.f32.partialorder %v1288_v13, %v1291_v17 }
 0x33d   :  { %v1293_v26 = vsel %vm1292_vm13, %v7687_v2, 8 }
 0x33e   :  { %v1294_v18 = vsel %vm612_vm0, %v1293_v26, 2147483647 }
 0x33f   :  { %v1296_v20 = vshra.s32 %v1294_v18, 16  ;;  %v1295_v22 = vand.u32 65535, %v1294_v18 }
 0x341   :  { %v1298_v4 = vcvt.s32.f32 %v1296_v20  ;;  %v1297_v23 = vcvt.s32.f32 %v1295_v22 }
 0x343   :  { %1299 = vmin.xlane.f32.xlu0 %v1298_v4 }
 0x3d0   :  { %v1300_v7 = vpop.xlane.xlu0 %1299 }
 0x3d1   :  { %vm1301_vm14 = vcmp.eq.f32.partialorder %v1298_v4, %v1300_v7  ;;  %v1306_v25 = vcvt.f32.s32 %v1300_v7 }
 0x3d2   :  { %v1302_v24 = vsel %vm1301_vm14, %v1297_v23, inf }
 0x3d3   :  { %1303 = vmin.xlane.f32.xlu1 %v1302_v24  ;;  %v1307_v32 = vshll.u32 %v1306_v25, 16 }
 0x460   :  { %v1304_v27 = vpop.xlane.xlu1 %1303 }
 0x461   :  { %v1305_v33 = vcvt.f32.s32 %v1304_v27 }
 0x463   :  { %v7952_v34 = vadd.s32 %v1307_v32, %v1305_v33 }
 0x465   :  { %vm1309_vm15 = vcmp.eq.s32.totalorder %v7687_v2, %v7952_v34 }
 0x466   :  { %v7003_v36 = vsel %vm1309_vm15, 1.0, %v7666_v51  ;;  %vm8020_vm1 = vmor %vm633_vm5, %vm1309_vm15 }
 0x467   :  { %v1314_v37 = vcombine.high %v7003_v36, %v7003_v36  ;;  %v1321_v29 = vrot.slane %v7003_v36, %v7844_v59 }
 0x469   :  { %v1329_v38 = vcombine.high %v1321_v29, %v1321_v29  ;;  %v1337_v39 = vrot.slane %v1321_v29, %v7844_v59  ;;  %v1328_v40 = vrot.slane %v1314_v37, %v7844_v59 }
 0x46b   :  { %v1351_v42 = vrot.slane %v1329_v38, %v7844_v59  ;;  %7285 = vmatmul.mubr.msk.f32.vlgmr.msra.gmra.mrb[8].mxu0 %vm612_vm0, %v1337_v39  ;;  %v1359_v44 = vcombine.high %v1337_v39, %v1337_v39  ;;  %v1330_v45 = vcombine.high %v1328_v40, %v1328_v40  ;;  %v1344_v48 = vrot.slane %v1328_v40, %v7844_v59 }
 0x46c   :  { %7293 = vmatpush3.msra.mxu0 %v7875_v8  ;;  %7294 = vmatprep.mubr.msk.f32.mxu0 %vm7667_vm4, %v7666_v51 }
 0x46d   :  { %7290 = vmatmul.mubr.msk.f32.vlgmr.msra.gmra.mrb[8].mxu1 %vm612_vm0, %v1351_v42  ;;  %7302 = vmatprep.subr.mxu0 %v7666_v51  ;;  %v1361_v46 = vcombine.high %v1351_v42, %v1351_v42  ;;  %v1358_v50 = vrot.slane %v1330_v45, %v7844_v59  ;;  %v1360_v52 = vcombine.high %v1344_v48, %v1344_v48 }
 0x46e   :  { %7298 = vmatpush3.msra.mxu1 %v7877_v9  ;;  %7299 = vmatprep.mubr.msk.f32.mxu1 %vm7667_vm4, %v7666_v51 }
 0x46f   :  { %7295 = vmatmul.mubr.msk.f32.vlgmr.msra.gmra.mrb[10].mxu0 %vm612_vm0, %v1359_v44  ;;  %7307 = vmatprep.subr.mxu1 %v7666_v51  ;;  %v1362_v53 = vcombine.high %v1358_v50, %v1358_v50 }
 0x470   :  { %7303 = vmatpush3.msra.mxu0 %v7887_v19  ;;  %7304 = vmatprep.mubr.msk.f32.mxu0 %vm7667_vm4, %v7666_v51 }
 0x471   :  { %7300 = vmatmul.mubr.msk.f32.vlgmr.msra.gmra.mrb[10].mxu1 %vm612_vm0, %v1361_v46  ;;  %7312 = vmatprep.subr.mxu0 %v7666_v51 }
 0x472   :  { %7308 = vmatpush3.msra.mxu1 %v7892_v58  ;;  %7309 = vmatprep.mubr.msk.f32.mxu1 %vm7667_vm4, %v7666_v51 }
 0x473   :  { %7305 = vmatmul.mubr.msk.f32.vlgmr.msra.gmra.mrb[12].mxu0 %vm612_vm0, %v1344_v48  ;;  %7317 = vmatprep.subr.mxu1 %v7666_v51 }
 0x474   :  { %7313 = vmatpush3.msra.mxu0 %v7902_v15  ;;  %7314 = vmatprep.mubr.msk.f32.mxu0 %vm7667_vm4, %v7666_v51 }
 0x475   :  { %7310 = vmatmul.mubr.msk.f32.vlgmr.msra.gmra.mrb[12].mxu1 %vm612_vm0, %v1358_v50  ;;  %7322 = vmatprep.subr.mxu0 %v7666_v51 }
 0x476   :  { %7318 = vmatpush3.msra.mxu1 %v7910_v35  ;;  %7319 = vmatprep.mubr.msk.f32.mxu1 %vm7667_vm4, %v7666_v51 }
 0x477   :  { %7315 = vmatmul.mubr.msk.f32.vlgmr.msra.gmra.mrb[14].mxu0 %vm612_vm0, %v1360_v52  ;;  %7327 = vmatprep.subr.mxu1 %v7666_v51 }
 0x478   :  { %7323 = vmatpush3.msra.mxu0 %v7815_v16  ;;  %7324 = vmatprep.mubr.msk.f32.mxu0 %vm7667_vm4, %v7666_v51 }
 0x479   :  { %7320 = vmatmul.mubr.msk.f32.vlgmr.msra.gmra.mrb[14].mxu1 %vm612_vm0, %v1362_v53  ;;  %7332 = vmatprep.subr.mxu0 %v7666_v51 }
 0x47a   :  { %7328 = vmatpush3.msra.mxu1 %v7789_v56  ;;  %7329 = vmatprep.mubr.msk.f32.mxu1 %vm7667_vm4, %v7666_v51 }
 0x47b   :  { %7337 = vmatprep.subr.mxu1 %v7666_v51 }
 0x53e   :  { %v1431_v54 = vpop.f32.mrb[8].mxu0 }
 0x53f   :  { %v7286_v28 = vpop.f32.mrb[9].mxu0 }
 0x540   :  { %v1503_v55 = vpop.f32.mrb[8].mxu1 }
 0x541   :  { %v1947_v30 = vrot.slane %v1503_v55, 7  ;;  %v7291_v31 = vpop.f32.mrb[9].mxu1 }
 0x542   :  { %v1575_v49 = vpop.f32.mrb[10].mxu0 }
 0x543   :  { %v1948_v57 = vsel %vm91_vm6, %v1947_v30, %v1431_v54  ;;  %v1949_v60 = vrot.slane %v1575_v49, 6  ;;  %v7296_v47 = vpop.f32.mrb[11].mxu0 }
 0x544   :  { %v1647_v61 = vpop.f32.mrb[10].mxu1 }
 0x545   :  { %v1950_v62 = vsel %vm92_vm7, %v1949_v60, %v1948_v57  ;;  %v1951_v63 = vrot.slane %v1647_v61, 5  ;;  %v7301_v0 = vpop.f32.mrb[11].mxu1 }
 0x546   :  { %v1719_v1 = vpop.f32.mrb[12].mxu0 }
 0x547   :  { %v1952_v43 = vsel %vm94_vm8, %v1951_v63, %v1950_v62  ;;  %v1953_v5 = vrot.slane %v1719_v1, 4  ;;  %v7306_v6 = vpop.f32.mrb[13].mxu0 }
 0x548   :  { %v1791_v11 = vpop.f32.mrb[12].mxu1 }
 0x549   :  { %v1954_v12 = vsel %vm8684_vm9, %v1953_v5, %v1952_v43  ;;  %v1955_v13 = vrot.slane %v1791_v11, 3  ;;  %v7311_v14 = vpop.f32.mrb[13].mxu1 }
 0x54a   :  { %v1863_v17 = vpop.f32.mrb[14].mxu0 }
 0x54b   :  { %v1956_v26 = vsel %vm8683_vm10, %v1955_v13, %v1954_v12  ;;  %v1957_v18 = vrot.slane %v1863_v17, 2  ;;  %v7316_v20 = vpop.f32.mrb[15].mxu0 }
 0x54c   :  { %v1935_v4 = vpop.f32.mrb[14].mxu1 }
 0x54d   :  { %v1958_v22 = vsel %vm8682_vm11, %v1957_v18, %v1956_v26  ;;  %v1959_v7 = vrot.slane %v1935_v4, 1  ;;  %v7321_v23 = vpop.f32.mrb[15].mxu1 }
 0x54f   :  { %v1960_v24 = vsel %vm8681_vm12, %v1959_v7, %v1958_v22 }
 0x550   :  { %v1962_v25 = vmin.f32 %v7943_v10, %v1960_v24 }
 0x552   :  { %v8027_v32 = vsel %vm8020_vm1, %v7943_v10, %v1962_v25 }
 0x553   :  { %v1966_v33 = vsel %vm8020_vm1, inf, %v8027_v32 }
 0x554   :  { %v1967_v36 = vsel %vm612_vm0, %v1966_v33, inf }
 0x555   :  { %1968 = vmin.xlane.f32.xlu0 %v1967_v36 }
 0x5e2   :  { %v1969_v34 = vpop.xlane.xlu0 %1968 }
 0x5e3   :  { %vm1970_vm2 = vcmp.eq.f32.partialorder %v1966_v33, %v1969_v34 }
 0x5e4   :  { %v1971_v41 = vsel %vm1970_vm2, %v7687_v2, 8 }
 0x5e5   :  { %v1972_v37 = vsel %vm612_vm0, %v1971_v41, 2147483647 }
 0x5e6   :  { %v1974_v29 = vshra.s32 %v1972_v37, 16  ;;  %v1973_v39 = vand.u32 65535, %v1972_v37 }
 0x5e8   :  { %v1976_v38 = vcvt.s32.f32 %v1974_v29  ;;  %v1975_v10 = vcvt.s32.f32 %v1973_v39 }
 0x5ea   :  { %1977 = vmin.xlane.f32.xlu1 %v1976_v38 }
 0x677   :  { %v1978_v40 = vpop.xlane.xlu1 %1977 }
 0x678   :  { %vm1979_vm3 = vcmp.eq.f32.partialorder %v1976_v38, %v1978_v40  ;;  %v1984_v44 = vcvt.f32.s32 %v1978_v40 }
 0x679   :  { %v1980_v42 = vsel %vm1979_vm3, %v1975_v10, inf }
 0x67a   :  { %1981 = vmin.xlane.f32.xlu0 %v1980_v42  ;;  %v1985_v46 = vshll.u32 %v1984_v44, 16 }
 0x707   :  { %v1982_v45 = vpop.xlane.xlu0 %1981 }
 0x708   :  { %v1983_v48 = vcvt.f32.s32 %v1982_v45 }
 0x70a   :  { %v8035_v50 = vadd.s32 %v1985_v46, %v1983_v48 }
 0x70c   :  { %vm1987_vm5 = vcmp.eq.s32.totalorder %v7687_v2, %v8035_v50 }
 0x70d   :  { %v7012_v52 = vsel %vm1987_vm5, 1.0, %v7666_v51  ;;  %vm8102_vm13 = vmor %vm8020_vm1, %vm1987_vm5 }
 0x70e   :  { %v1992_v53 = vcombine.high %v7012_v52, %v7012_v52  ;;  %v1999_v54 = vrot.slane %v7012_v52, %v7844_v59 }
 0x710   :  { %v2007_v28 = vcombine.high %v1999_v54, %v1999_v54  ;;  %v2015_v55 = vrot.slane %v1999_v54, %v7844_v59  ;;  %v2006_v30 = vrot.slane %v1992_v53, %v7844_v59 }
 0x712   :  { %v2029_v31 = vrot.slane %v2007_v28, %v7844_v59  ;;  %7325 = vmatmul.mubr.msk.f32.vlgmr.msra.gmra.mrb[16].mxu0 %vm612_vm0, %v2015_v55  ;;  %v2037_v49 = vcombine.high %v2015_v55, %v2015_v55  ;;  %v2008_v57 = vcombine.high %v2006_v30, %v2006_v30  ;;  %v2022_v47 = vrot.slane %v2006_v30, %v7844_v59 }
 0x713   :  { %7333 = vmatpush3.msra.mxu0 %v7875_v8  ;;  %7334 = vmatprep.mubr.msk.f32.mxu0 %vm7667_vm4, %v7666_v51 }
 0x714   :  { %7330 = vmatmul.mubr.msk.f32.vlgmr.msra.gmra.mrb[16].mxu1 %vm612_vm0, %v2029_v31  ;;  %7342 = vmatprep.subr.mxu0 %v7666_v51  ;;  %v2039_v60 = vcombine.high %v2029_v31, %v2029_v31  ;;  %v2036_v61 = vrot.slane %v2008_v57, %v7844_v59  ;;  %v2038_v62 = vcombine.high %v2022_v47, %v2022_v47 }
 0x715   :  { %7338 = vmatpush3.msra.mxu1 %v7877_v9  ;;  %7339 = vmatprep.mubr.msk.f32.mxu1 %vm7667_vm4, %v7666_v51 }
 0x716   :  { %7335 = vmatmul.mubr.msk.f32.vlgmr.msra.gmra.mrb[18].mxu0 %vm612_vm0, %v2037_v49  ;;  %7347 = vmatprep.subr.mxu1 %v7666_v51  ;;  %v2040_v63 = vcombine.high %v2036_v61, %v2036_v61 }
 0x717   :  { %7343 = vmatpush3.msra.mxu0 %v7887_v19  ;;  %7344 = vmatprep.mubr.msk.f32.mxu0 %vm7667_vm4, %v7666_v51 }
 0x718   :  { %7340 = vmatmul.mubr.msk.f32.vlgmr.msra.gmra.mrb[18].mxu1 %vm612_vm0, %v2039_v60  ;;  %7352 = vmatprep.subr.mxu0 %v7666_v51 }
 0x719   :  { %7348 = vmatpush3.msra.mxu1 %v7892_v58  ;;  %7349 = vmatprep.mubr.msk.f32.mxu1 %vm7667_vm4, %v7666_v51 }
 0x71a   :  { %7345 = vmatmul.mubr.msk.f32.vlgmr.msra.gmra.mrb[20].mxu0 %vm612_vm0, %v2022_v47  ;;  %7357 = vmatprep.subr.mxu1 %v7666_v51 }
 0x71b   :  { %7353 = vmatpush3.msra.mxu0 %v7902_v15  ;;  %7354 = vmatprep.mubr.msk.f32.mxu0 %vm7667_vm4, %v7666_v51 }
 0x71c   :  { %7350 = vmatmul.mubr.msk.f32.vlgmr.msra.gmra.mrb[20].mxu1 %vm612_vm0, %v2036_v61  ;;  %7362 = vmatprep.subr.mxu0 %v7666_v51 }
 0x71d   :  { %7358 = vmatpush3.msra.mxu1 %v7910_v35  ;;  %7359 = vmatprep.mubr.msk.f32.mxu1 %vm7667_vm4, %v7666_v51 }
 0x71e   :  { %7355 = vmatmul.mubr.msk.f32.vlgmr.msra.gmra.mrb[22].mxu0 %vm612_vm0, %v2038_v62  ;;  %7367 = vmatprep.subr.mxu1 %v7666_v51 }
 0x71f   :  { %7363 = vmatpush3.msra.mxu0 %v7815_v16  ;;  %7364 = vmatprep.mubr.msk.f32.mxu0 %vm7667_vm4, %v7666_v51 }
 0x720   :  { %7360 = vmatmul.mubr.msk.f32.vlgmr.msra.gmra.mrb[22].mxu1 %vm612_vm0, %v2040_v63  ;;  %7372 = vmatprep.subr.mxu0 %v7666_v51 }
 0x721   :  { %7368 = vmatpush3.msra.mxu1 %v7789_v56  ;;  %7369 = vmatprep.mubr.msk.f32.mxu1 %vm7667_vm4, %v7666_v51 }
 0x722   :  { %7377 = vmatprep.subr.mxu1 %v7666_v51 }
 0x7e5   :  { %v2109_v0 = vpop.f32.mrb[16].mxu0 }
 0x7e6   :  { %v7326_v1 = vpop.f32.mrb[17].mxu0 }
 0x7e7   :  { %v2181_v43 = vpop.f32.mrb[16].mxu1 }
 0x7e8   :  { %v2625_v5 = vrot.slane %v2181_v43, 7  ;;  %v7331_v6 = vpop.f32.mrb[17].mxu1 }
 0x7e9   :  { %v2253_v11 = vpop.f32.mrb[18].mxu0 }
 0x7ea   :  { %v2626_v12 = vsel %vm91_vm6, %v2625_v5, %v2109_v0  ;;  %v2627_v13 = vrot.slane %v2253_v11, 6  ;;  %v7336_v14 = vpop.f32.mrb[19].mxu0 }
 0x7eb   :  { %v2325_v17 = vpop.f32.mrb[18].mxu1 }
 0x7ec   :  { %v2628_v26 = vsel %vm92_vm7, %v2627_v13, %v2626_v12  ;;  %v2629_v18 = vrot.slane %v2325_v17, 5  ;;  %v7341_v20 = vpop.f32.mrb[19].mxu1 }
 0x7ed   :  { %v2397_v4 = vpop.f32.mrb[20].mxu0 }
 0x7ee   :  { %v2630_v22 = vsel %vm94_vm8, %v2629_v18, %v2628_v26  ;;  %v2631_v7 = vrot.slane %v2397_v4, 4  ;;  %v7346_v23 = vpop.f32.mrb[21].mxu0 }
 0x7ef   :  { %v2469_v24 = vpop.f32.mrb[20].mxu1 }
 0x7f0   :  { %v2632_v25 = vsel %vm8684_vm9, %v2631_v7, %v2630_v22  ;;  %v2633_v33 = vrot.slane %v2469_v24, 3  ;;  %v7351_v36 = vpop.f32.mrb[21].mxu1 }
 0x7f1   :  { %v2541_v34 = vpop.f32.mrb[22].mxu0 }
 0x7f2   :  { %v2634_v41 = vsel %vm8683_vm10, %v2633_v33, %v2632_v25  ;;  %v2635_v37 = vrot.slane %v2541_v34, 2  ;;  %v7356_v29 = vpop.f32.mrb[23].mxu0 }
 0x7f3   :  { %v2613_v38 = vpop.f32.mrb[22].mxu1 }
 0x7f4   :  { %v2636_v39 = vsel %vm8682_vm11, %v2635_v37, %v2634_v41  ;;  %v2637_v40 = vrot.slane %v2613_v38, 1  ;;  %v7361_v10 = vpop.f32.mrb[23].mxu1 }
 0x7f6   :  { %v2638_v42 = vsel %vm8681_vm12, %v2637_v40, %v2636_v39 }
 0x7f7   :  { %v2640_v44 = vmin.f32 %v8027_v32, %v2638_v42 }
 0x7f9   :  { %v8109_v46 = vsel %vm8102_vm13, %v8027_v32, %v2640_v44 }
 0x7fa   :  { %v2644_v48 = vsel %vm8102_vm13, inf, %v8109_v46 }
 0x7fb   :  { %v2645_v52 = vsel %vm612_vm0, %v2644_v48, inf }
 0x7fc   :  { %2646 = vmin.xlane.f32.xlu1 %v2645_v52 }
 0x889   :  { %v2647_v53 = vpop.xlane.xlu1 %2646 }
 0x88a   :  { %vm2648_vm14 = vcmp.eq.f32.partialorder %v2644_v48, %v2647_v53 }
 0x88b   :  { %v2649_v27 = vsel %vm2648_vm14, %v7687_v2, 8 }
 0x88c   :  { %v2650_v50 = vsel %vm612_vm0, %v2649_v27, 2147483647 }
 0x88d   :  { %v2652_v54 = vshra.s32 %v2650_v50, 16  ;;  %v2651_v55 = vand.u32 65535, %v2650_v50 }
 0x88f   :  { %v2654_v28 = vcvt.s32.f32 %v2652_v54  ;;  %v2653_v32 = vcvt.s32.f32 %v2651_v55 }
 0x891   :  { %2655 = vmin.xlane.f32.xlu0 %v2654_v28 }
 0x91e   :  { %v2656_v30 = vpop.xlane.xlu0 %2655 }
 0x91f   :  { %vm2657_vm15 = vcmp.eq.f32.partialorder %v2654_v28, %v2656_v30  ;;  %v2662_v49 = vcvt.f32.s32 %v2656_v30 }
 0x920   :  { %v2658_v31 = vsel %vm2657_vm15, %v2653_v32, inf }
 0x921   :  { %2659 = vmin.xlane.f32.xlu1 %v2658_v31  ;;  %v2663_v60 = vshll.u32 %v2662_v49, 16 }
 0x9ae   :  { %v2660_v57 = vpop.xlane.xlu1 %2659 }
 0x9af   :  { %v2661_v47 = vcvt.f32.s32 %v2660_v57 }
 0x9b1   :  { %v8117_v61 = vadd.s32 %v2663_v60, %v2661_v47 }
 0x9b3   :  { %vm2665_vm1 = vcmp.eq.s32.totalorder %v7687_v2, %v8117_v61 }
 0x9b4   :  { %v7021_v62 = vsel %vm2665_vm1, 1.0, %v7666_v51  ;;  %vm8184_vm2 = vmor %vm8102_vm13, %vm2665_vm1 }
 0x9b5   :  { %v2670_v63 = vcombine.high %v7021_v62, %v7021_v62  ;;  %v2677_v0 = vrot.slane %v7021_v62, %v7844_v59 }
 0x9b7   :  { %v2685_v1 = vcombine.high %v2677_v0, %v2677_v0  ;;  %v2693_v43 = vrot.slane %v2677_v0, %v7844_v59  ;;  %v2684_v5 = vrot.slane %v2670_v63, %v7844_v59 }
 0x9b9   :  { %v2707_v6 = vrot.slane %v2685_v1, %v7844_v59  ;;  %7365 = vmatmul.mubr.msk.f32.vlgmr.msra.gmra.mrb[24].mxu0 %vm612_vm0, %v2693_v43  ;;  %v2715_v11 = vcombine.high %v2693_v43, %v2693_v43  ;;  %v2686_v12 = vcombine.high %v2684_v5, %v2684_v5  ;;  %v2700_v14 = vrot.slane %v2684_v5, %v7844_v59 }
 0x9ba   :  { %7373 = vmatpush3.msra.mxu0 %v7875_v8  ;;  %7374 = vmatprep.mubr.msk.f32.mxu0 %vm7667_vm4, %v7666_v51 }
 0x9bb   :  { %7370 = vmatmul.mubr.msk.f32.vlgmr.msra.gmra.mrb[24].mxu1 %vm612_vm0, %v2707_v6  ;;  %7382 = vmatprep.subr.mxu0 %v7666_v51  ;;  %v2717_v13 = vcombine.high %v2707_v6, %v2707_v6  ;;  %v2714_v17 = vrot.slane %v2686_v12, %v7844_v59  ;;  %v2716_v26 = vcombine.high %v2700_v14, %v2700_v14 }
 0x9bc   :  { %7378 = vmatpush3.msra.mxu1 %v7877_v9  ;;  %7379 = vmatprep.mubr.msk.f32.mxu1 %vm7667_vm4, %v7666_v51 }
 0x9bd   :  { %7375 = vmatmul.mubr.msk.f32.vlgmr.msra.gmra.mrb[26].mxu0 %vm612_vm0, %v2715_v11  ;;  %7387 = vmatprep.subr.mxu1 %v7666_v51  ;;  %v2718_v18 = vcombine.high %v2714_v17, %v2714_v17 }
 0x9be   :  { %7383 = vmatpush3.msra.mxu0 %v7887_v19  ;;  %7384 = vmatprep.mubr.msk.f32.mxu0 %vm7667_vm4, %v7666_v51 }
 0x9bf   :  { %7380 = vmatmul.mubr.msk.f32.vlgmr.msra.gmra.mrb[26].mxu1 %vm612_vm0, %v2717_v13  ;;  %7392 = vmatprep.subr.mxu0 %v7666_v51 }
 0x9c0   :  { %7388 = vmatpush3.msra.mxu1 %v7892_v58  ;;  %7389 = vmatprep.mubr.msk.f32.mxu1 %vm7667_vm4, %v7666_v51 }
 0x9c1   :  { %7385 = vmatmul.mubr.msk.f32.vlgmr.msra.gmra.mrb[28].mxu0 %vm612_vm0, %v2700_v14  ;;  %7397 = vmatprep.subr.mxu1 %v7666_v51 }
 0x9c2   :  { %7393 = vmatpush3.msra.mxu0 %v7902_v15  ;;  %7394 = vmatprep.mubr.msk.f32.mxu0 %vm7667_vm4, %v7666_v51 }
 0x9c3   :  { %7390 = vmatmul.mubr.msk.f32.vlgmr.msra.gmra.mrb[28].mxu1 %vm612_vm0, %v2714_v17  ;;  %7402 = vmatprep.subr.mxu0 %v7666_v51 }
 0x9c4   :  { %7398 = vmatpush3.msra.mxu1 %v7910_v35  ;;  %7399 = vmatprep.mubr.msk.f32.mxu1 %vm7667_vm4, %v7666_v51 }
 0x9c5   :  { %7395 = vmatmul.mubr.msk.f32.vlgmr.msra.gmra.mrb[30].mxu0 %vm612_vm0, %v2716_v26  ;;  %7407 = vmatprep.subr.mxu1 %v7666_v51 }
 0x9c6   :  { %7403 = vmatpush3.msra.mxu0 %v7815_v16  ;;  %7404 = vmatprep.mubr.msk.f32.mxu0 %vm7667_vm4, %v7666_v51 }
 0x9c7   :  { %7400 = vmatmul.mubr.msk.f32.vlgmr.msra.gmra.mrb[30].mxu1 %vm612_vm0, %v2718_v18  ;;  %7412 = vmatprep.subr.mxu0 %v7666_v51 }
 0x9c8   :  { %7408 = vmatpush3.msra.mxu1 %v7789_v56  ;;  %7409 = vmatprep.mubr.msk.f32.mxu1 %vm7667_vm4, %v7666_v51 }
 0x9c9   :  { %7417 = vmatprep.subr.mxu1 %v7666_v51 }
 0xa8c   :  { %v2787_v20 = vpop.f32.mrb[24].mxu0 }
 0xa8d   :  { %v7366_v4 = vpop.f32.mrb[25].mxu0 }
 0xa8e   :  { %v2859_v22 = vpop.f32.mrb[24].mxu1 }
 0xa8f   :  { %v3303_v7 = vrot.slane %v2859_v22, 7  ;;  %v7371_v23 = vpop.f32.mrb[25].mxu1 }
 0xa90   :  { %v2931_v24 = vpop.f32.mrb[26].mxu0 }
 0xa91   :  { %v3304_v25 = vsel %vm91_vm6, %v3303_v7, %v2787_v20  ;;  %v3305_v33 = vrot.slane %v2931_v24, 6  ;;  %v7376_v36 = vpop.f32.mrb[27].mxu0 }
 0xa92   :  { %v3003_v34 = vpop.f32.mrb[26].mxu1 }
 0xa93   :  { %v3306_v41 = vsel %vm92_vm7, %v3305_v33, %v3304_v25  ;;  %v3307_v37 = vrot.slane %v3003_v34, 5  ;;  %v7381_v29 = vpop.f32.mrb[27].mxu1 }
 0xa94   :  { %v3075_v38 = vpop.f32.mrb[28].mxu0 }
 0xa95   :  { %v3308_v39 = vsel %vm94_vm8, %v3307_v37, %v3306_v41  ;;  %v3309_v40 = vrot.slane %v3075_v38, 4  ;;  %v7386_v10 = vpop.f32.mrb[29].mxu0 }
 0xa96   :  { %v3147_v42 = vpop.f32.mrb[28].mxu1 }
 0xa97   :  { %v3310_v44 = vsel %vm8684_vm9, %v3309_v40, %v3308_v39  ;;  %v3311_v48 = vrot.slane %v3147_v42, 3  ;;  %v7391_v52 = vpop.f32.mrb[29].mxu1 }
 0xa98   :  { %v3219_v53 = vpop.f32.mrb[30].mxu0 }
 0xa99   :  { %v3312_v27 = vsel %vm8683_vm10, %v3311_v48, %v3310_v44  ;;  %v3313_v50 = vrot.slane %v3219_v53, 2  ;;  %v7396_v54 = vpop.f32.mrb[31].mxu0 }
 0xa9a   :  { %v3291_v28 = vpop.f32.mrb[30].mxu1 }
 0xa9b   :  { %v3314_v55 = vsel %vm8682_vm11, %v3313_v50, %v3312_v27  ;;  %v3315_v30 = vrot.slane %v3291_v28, 1  ;;  %v7401_v32 = vpop.f32.mrb[31].mxu1 }
 0xa9d   :  { %v3316_v31 = vsel %vm8681_vm12, %v3315_v30, %v3314_v55 }
 0xa9e   :  { %v3318_v49 = vmin.f32 %v8109_v46, %v3316_v31 }
 0xaa0   :  { %v8191_v60 = vsel %vm8184_vm2, %v8109_v46, %v3318_v49 }
 0xaa1   :  { %v3322_v47 = vsel %vm8184_vm2, inf, %v8191_v60 }
 0xaa2   :  { %v3323_v62 = vsel %vm612_vm0, %v3322_v47, inf }
 0xaa3   :  { %3324 = vmin.xlane.f32.xlu0 %v3323_v62 }
 0xb30   :  { %v3325_v63 = vpop.xlane.xlu0 %3324 }
 0xb31   :  { %vm3326_vm3 = vcmp.eq.f32.partialorder %v3322_v47, %v3325_v63 }
 0xb32   :  { %v3327_v45 = vsel %vm3326_vm3, %v7687_v2, 8 }
 0xb33   :  { %v3328_v61 = vsel %vm612_vm0, %v3327_v45, 2147483647 }
 0xb34   :  { %v3330_v0 = vshra.s32 %v3328_v61, 16  ;;  %v3329_v43 = vand.u32 65535, %v3328_v61 }
 0xb36   :  { %v3332_v1 = vcvt.s32.f32 %v3330_v0  ;;  %v3331_v46 = vcvt.s32.f32 %v3329_v43 }
 0xb38   :  { %3333 = vmin.xlane.f32.xlu1 %v3332_v1 }
 0xbc5   :  { %v3334_v5 = vpop.xlane.xlu1 %3333 }
 0xbc6   :  { %vm3335_vm5 = vcmp.eq.f32.partialorder %v3332_v1, %v3334_v5  ;;  %v3340_v11 = vcvt.f32.s32 %v3334_v5 }
 0xbc7   :  { %v3336_v6 = vsel %vm3335_vm5, %v3331_v46, inf }
 0xbc8   :  { %3337 = vmin.xlane.f32.xlu0 %v3336_v6  ;;  %v3341_v13 = vshll.u32 %v3340_v11, 16 }
 0xc55   :  { %v3338_v12 = vpop.xlane.xlu0 %3337 }
 0xc56   :  { %v3339_v14 = vcvt.f32.s32 %v3338_v12 }
 0xc58   :  { %v8199_v17 = vadd.s32 %v3341_v13, %v3339_v14 }
 0xc5a   :  { %vm3343_vm13 = vcmp.eq.s32.totalorder %v7687_v2, %v8199_v17 }
 0xc5b   :  { %v7030_v26 = vsel %vm3343_vm13, 1.0, %v7666_v51  ;;  %vm3344_vm14 = vmor %vm8184_vm2, %vm3343_vm13 }
 0xc5c   :  { %v3348_v18 = vcombine.high %v7030_v26, %v7030_v26  ;;  %v3355_v20 = vrot.slane %v7030_v26, %v7844_v59  ;;  %v8266_v11 = vsel %vm3344_vm14, 1, %v7661_v3 }
 0xc5d   :  { %vm3999_vm15 = vcmp.gt.s32.totalorder %v8266_v11, 0 }
 0xc5e   :  { %v3363_v4 = vcombine.high %v3355_v20, %v3355_v20  ;;  %v3371_v22 = vrot.slane %v3355_v20, %v7844_v59  ;;  %v3362_v7 = vrot.slane %v3348_v18, %v7844_v59 }
 0xc60   :  { %v3385_v23 = vrot.slane %v3363_v4, %v7844_v59  ;;  %7405 = vmatmul.mubr.msk.f32.vlgmr.msra.gmra.mrb[32].mxu0 %vm612_vm0, %v3371_v22  ;;  %v3393_v24 = vcombine.high %v3371_v22, %v3371_v22  ;;  %v3364_v25 = vcombine.high %v3362_v7, %v3362_v7  ;;  %v3378_v36 = vrot.slane %v3362_v7, %v7844_v59 }
 0xc61   :  { %7413 = vmatpush3.msra.mxu0 %v7875_v8  ;;  %7414 = vmatprep.mubr.msk.f32.mxu0 %vm7667_vm4, %v7666_v51 }
 0xc62   :  { %7410 = vmatmul.mubr.msk.f32.vlgmr.msra.gmra.mrb[32].mxu1 %vm612_vm0, %v3385_v23  ;;  %7422 = vmatprep.subr.mxu0 %v7666_v51  ;;  %v3395_v33 = vcombine.high %v3385_v23, %v3385_v23  ;;  %v3392_v34 = vrot.slane %v3364_v25, %v7844_v59  ;;  %v3394_v41 = vcombine.high %v3378_v36, %v3378_v36 }
 0xc63   :  { %7418 = vmatpush3.msra.mxu1 %v7877_v9  ;;  %7419 = vmatprep.mubr.msk.f32.mxu1 %vm7667_vm4, %v7666_v51 }
 0xc64   :  { %7415 = vmatmul.mubr.msk.f32.vlgmr.msra.gmra.mrb[34].mxu0 %vm612_vm0, %v3393_v24  ;;  %7427 = vmatprep.subr.mxu1 %v7666_v51  ;;  %v3396_v37 = vcombine.high %v3392_v34, %v3392_v34 }
 0xc65   :  { %7423 = vmatpush3.msra.mxu0 %v7887_v19  ;;  %7424 = vmatprep.mubr.msk.f32.mxu0 %vm7667_vm4, %v7666_v51 }
 0xc66   :  { %7420 = vmatmul.mubr.msk.f32.vlgmr.msra.gmra.mrb[34].mxu1 %vm612_vm0, %v3395_v33  ;;  %7432 = vmatprep.subr.mxu0 %v7666_v51 }
 0xc67   :  { %7428 = vmatpush3.msra.mxu1 %v7892_v58  ;;  %7429 = vmatprep.mubr.msk.f32.mxu1 %vm7667_vm4, %v7666_v51 }
 0xc68   :  { %7425 = vmatmul.mubr.msk.f32.vlgmr.msra.gmra.mrb[36].mxu0 %vm612_vm0, %v3378_v36  ;;  %7437 = vmatprep.subr.mxu1 %v7666_v51 }
 0xc69   :  { %7433 = vmatpush3.msra.mxu0 %v7902_v15  ;;  %7434 = vmatprep.mubr.msk.f32.mxu0 %vm7667_vm4, %v7666_v51 }
 0xc6a   :  { %7430 = vmatmul.mubr.msk.f32.vlgmr.msra.gmra.mrb[36].mxu1 %vm612_vm0, %v3392_v34  ;;  %7442 = vmatprep.subr.mxu0 %v7666_v51 }
 0xc6b   :  { %7438 = vmatpush3.msra.mxu1 %v7910_v35  ;;  %7439 = vmatprep.mubr.msk.f32.mxu1 %vm7667_vm4, %v7666_v51 }
 0xc6c   :  { %7435 = vmatmul.mubr.msk.f32.vlgmr.msra.gmra.mrb[38].mxu0 %vm612_vm0, %v3394_v41  ;;  %7447 = vmatprep.subr.mxu1 %v7666_v51 }
 0xc6d   :  { %7443 = vmatpush3.msra.mxu0 %v7815_v16  ;;  %7444 = vmatprep.mubr.msk.f32.mxu0 %vm7667_vm4, %v7666_v51 }
 0xc6e   :  { %7440 = vmatmul.mubr.msk.f32.vlgmr.msra.gmra.mrb[38].mxu1 %vm612_vm0, %v3396_v37  ;;  %7452 = vmatprep.subr.mxu0 %v7666_v51 }
 0xc6f   :  { %7448 = vmatpush3.msra.mxu1 %v7789_v56  ;;  %7449 = vmatprep.mubr.msk.f32.mxu1 %vm7667_vm4, %v7666_v51 }
 0xc70   :  { %7457 = vmatprep.subr.mxu1 %v7666_v51 }
 0xd33   :  { %v3465_v29 = vpop.f32.mrb[32].mxu0 }
 0xd34   :  { %v7406_v38 = vpop.f32.mrb[33].mxu0 }
 0xd35   :  { %v3537_v39 = vpop.f32.mrb[32].mxu1 }
 0xd36   :  { %v3981_v40 = vrot.slane %v3537_v39, 7  ;;  %v7411_v10 = vpop.f32.mrb[33].mxu1 }
 0xd37   :  { %v3609_v42 = vpop.f32.mrb[34].mxu0 }
 0xd38   :  { %v3982_v44 = vsel %vm91_vm6, %v3981_v40, %v3465_v29  ;;  %v3983_v48 = vrot.slane %v3609_v42, 6  ;;  %v7416_v52 = vpop.f32.mrb[35].mxu0 }
 0xd39   :  { %v3681_v53 = vpop.f32.mrb[34].mxu1 }
 0xd3a   :  { %v3984_v27 = vsel %vm92_vm7, %v3983_v48, %v3982_v44  ;;  %v3985_v50 = vrot.slane %v3681_v53, 5  ;;  %v7421_v54 = vpop.f32.mrb[35].mxu1 }
 0xd3b   :  { %v3753_v28 = vpop.f32.mrb[36].mxu0 }
 0xd3c   :  { %v3986_v55 = vsel %vm94_vm8, %v3985_v50, %v3984_v27  ;;  %v3987_v30 = vrot.slane %v3753_v28, 4  ;;  %v7426_v32 = vpop.f32.mrb[37].mxu0 }
 0xd3d   :  { %v3825_v31 = vpop.f32.mrb[36].mxu1 }
 0xd3e   :  { %v3988_v49 = vsel %vm8684_vm9, %v3987_v30, %v3986_v55  ;;  %v3989_v47 = vrot.slane %v3825_v31, 3  ;;  %v7431_v62 = vpop.f32.mrb[37].mxu1 }
 0xd3f   :  { %v3897_v63 = vpop.f32.mrb[38].mxu0 }
 0xd40   :  { %v3990_v45 = vsel %vm8683_vm10, %v3989_v47, %v3988_v49  ;;  %v3991_v61 = vrot.slane %v3897_v63, 2  ;;  %v7436_v0 = vpop.f32.mrb[39].mxu0 }
 0xd41   :  { %v3969_v1 = vpop.f32.mrb[38].mxu1 }
 0xd42   :  { %v3992_v43 = vsel %vm8682_vm11, %v3991_v61, %v3990_v45  ;;  %v3993_v5 = vrot.slane %v3969_v1, 1  ;;  %v7441_v46 = vpop.f32.mrb[39].mxu1 }
 0xd44   :  { %v3994_v6 = vsel %vm8681_vm12, %v3993_v5, %v3992_v43 }
 0xd45   :  { %v3996_v12 = vmin.f32 %v8191_v60, %v3994_v6 }
 0xd47   :  { %v8270_v13 = vsel %vm3344_vm14, %v8191_v60, %v3996_v12 }
 0xd48   :  { %v4000_v57 = vsel %vm3999_vm15, inf, %v8270_v13 }
 0xd49   :  { %v4001_v14 = vsel %vm612_vm0, %v4000_v57, inf }
 0xd4a   :  { %4002 = vmin.xlane.f32.xlu1 %v4001_v14 }
 0xdd7   :  { %v4003_v17 = vpop.xlane.xlu1 %4002 }
 0xdd8   :  { %vm4004_vm1 = vcmp.eq.f32.partialorder %v4000_v57, %v4003_v17 }
 0xdd9   :  { %v4005_v26 = vsel %vm4004_vm1, %v7687_v2, 8 }
 0xdda   :  { %v4006_v18 = vsel %vm612_vm0, %v4005_v26, 2147483647 }
 0xddb   :  { %v4008_v20 = vshra.s32 %v4006_v18, 16  ;;  %v4007_v60 = vand.u32 65535, %v4006_v18 }
 0xddd   :  { %v4010_v4 = vcvt.s32.f32 %v4008_v20  ;;  %v4009_v7 = vcvt.s32.f32 %v4007_v60 }
 0xddf   :  { %4011 = vmin.xlane.f32.xlu0 %v4010_v4 }
 0xe6c   :  { %v4012_v22 = vpop.xlane.xlu0 %4011 }
 0xe6d   :  { %vm4013_vm2 = vcmp.eq.f32.partialorder %v4010_v4, %v4012_v22  ;;  %v4018_v24 = vcvt.f32.s32 %v4012_v22 }
 0xe6e   :  { %v4014_v23 = vsel %vm4013_vm2, %v4009_v7, inf }
 0xe6f   :  { %4015 = vmin.xlane.f32.xlu1 %v4014_v23  ;;  %v4019_v33 = vshll.u32 %v4018_v24, 16 }
 0xefc   :  { %v4016_v25 = vpop.xlane.xlu1 %4015 }
 0xefd   :  { %v4017_v36 = vcvt.f32.s32 %v4016_v25 }
 0xeff   :  { %v8279_v34 = vadd.s32 %v4019_v33, %v4017_v36 }
 0xf01   :  { %vm4021_vm3 = vcmp.eq.s32.totalorder %v7687_v2, %v8279_v34 }
 0xf02   :  { %v7039_v41 = vsel %vm4021_vm3, 1.0, %v7666_v51  ;;  %vm8346_vm5 = vmor %vm3999_vm15, %vm4021_vm3 }
 0xf03   :  { %v4026_v37 = vcombine.high %v7039_v41, %v7039_v41  ;;  %v4033_v29 = vrot.slane %v7039_v41, %v7844_v59 }
 0xf05   :  { %v4041_v38 = vcombine.high %v4033_v29, %v4033_v29  ;;  %v4049_v39 = vrot.slane %v4033_v29, %v7844_v59  ;;  %v4040_v40 = vrot.slane %v4026_v37, %v7844_v59 }
 0xf07   :  { %v4063_v10 = vrot.slane %v4041_v38, %v7844_v59  ;;  %7445 = vmatmul.mubr.msk.f32.vlgmr.msra.gmra.mrb[40].mxu0 %vm612_vm0, %v4049_v39  ;;  %v4071_v42 = vcombine.high %v4049_v39, %v4049_v39  ;;  %v4042_v44 = vcombine.high %v4040_v40, %v4040_v40  ;;  %v4056_v52 = vrot.slane %v4040_v40, %v7844_v59 }
 0xf08   :  { %7453 = vmatpush3.msra.mxu0 %v7875_v8  ;;  %7454 = vmatprep.mubr.msk.f32.mxu0 %vm7667_vm4, %v7666_v51 }
 0xf09   :  { %7450 = vmatmul.mubr.msk.f32.vlgmr.msra.gmra.mrb[40].mxu1 %vm612_vm0, %v4063_v10  ;;  %7462 = vmatprep.subr.mxu0 %v7666_v51  ;;  %v4073_v48 = vcombine.high %v4063_v10, %v4063_v10  ;;  %v4070_v53 = vrot.slane %v4042_v44, %v7844_v59  ;;  %v4072_v27 = vcombine.high %v4056_v52, %v4056_v52 }
 0xf0a   :  { %7458 = vmatpush3.msra.mxu1 %v7877_v9  ;;  %7459 = vmatprep.mubr.msk.f32.mxu1 %vm7667_vm4, %v7666_v51 }
 0xf0b   :  { %7455 = vmatmul.mubr.msk.f32.vlgmr.msra.gmra.mrb[42].mxu0 %vm612_vm0, %v4071_v42  ;;  %7467 = vmatprep.subr.mxu1 %v7666_v51  ;;  %v4074_v50 = vcombine.high %v4070_v53, %v4070_v53 }
 0xf0c   :  { %7463 = vmatpush3.msra.mxu0 %v7887_v19  ;;  %7464 = vmatprep.mubr.msk.f32.mxu0 %vm7667_vm4, %v7666_v51 }
 0xf0d   :  { %7460 = vmatmul.mubr.msk.f32.vlgmr.msra.gmra.mrb[42].mxu1 %vm612_vm0, %v4073_v48  ;;  %7472 = vmatprep.subr.mxu0 %v7666_v51 }
 0xf0e   :  { %7468 = vmatpush3.msra.mxu1 %v7892_v58  ;;  %7469 = vmatprep.mubr.msk.f32.mxu1 %vm7667_vm4, %v7666_v51 }
 0xf0f   :  { %7465 = vmatmul.mubr.msk.f32.vlgmr.msra.gmra.mrb[44].mxu0 %vm612_vm0, %v4056_v52  ;;  %7477 = vmatprep.subr.mxu1 %v7666_v51 }
 0xf10   :  { %7473 = vmatpush3.msra.mxu0 %v7902_v15  ;;  %7474 = vmatprep.mubr.msk.f32.mxu0 %vm7667_vm4, %v7666_v51 }
 0xf11   :  { %7470 = vmatmul.mubr.msk.f32.vlgmr.msra.gmra.mrb[44].mxu1 %vm612_vm0, %v4070_v53  ;;  %7482 = vmatprep.subr.mxu0 %v7666_v51 }
 0xf12   :  { %7478 = vmatpush3.msra.mxu1 %v7910_v35  ;;  %7479 = vmatprep.mubr.msk.f32.mxu1 %vm7667_vm4, %v7666_v51 }
 0xf13   :  { %7475 = vmatmul.mubr.msk.f32.vlgmr.msra.gmra.mrb[46].mxu0 %vm612_vm0, %v4072_v27  ;;  %7487 = vmatprep.subr.mxu1 %v7666_v51 }
 0xf14   :  { %7483 = vmatpush3.msra.mxu0 %v7815_v16  ;;  %7484 = vmatprep.mubr.msk.f32.mxu0 %vm7667_vm4, %v7666_v51 }
 0xf15   :  { %7480 = vmatmul.mubr.msk.f32.vlgmr.msra.gmra.mrb[46].mxu1 %vm612_vm0, %v4074_v50  ;;  %7492 = vmatprep.subr.mxu0 %v7666_v51 }
 0xf16   :  { %7488 = vmatpush3.msra.mxu1 %v7789_v56  ;;  %7489 = vmatprep.mubr.msk.f32.mxu1 %vm7667_vm4, %v7666_v51 }
 0xf17   :  { %7497 = vmatprep.subr.mxu1 %v7666_v51 }
 0xfda   :  { %v4143_v54 = vpop.f32.mrb[40].mxu0 }
 0xfdb   :  { %v7446_v28 = vpop.f32.mrb[41].mxu0 }
 0xfdc   :  { %v4215_v55 = vpop.f32.mrb[40].mxu1 }
 0xfdd   :  { %v4659_v30 = vrot.slane %v4215_v55, 7  ;;  %v7451_v32 = vpop.f32.mrb[41].mxu1 }
 0xfde   :  { %v4287_v31 = vpop.f32.mrb[42].mxu0 }
 0xfdf   :  { %v4660_v49 = vsel %vm91_vm6, %v4659_v30, %v4143_v54  ;;  %v4661_v47 = vrot.slane %v4287_v31, 6  ;;  %v7456_v62 = vpop.f32.mrb[43].mxu0 }
 0xfe0   :  { %v4359_v63 = vpop.f32.mrb[42].mxu1 }
 0xfe1   :  { %v4662_v45 = vsel %vm92_vm7, %v4661_v47, %v4660_v49  ;;  %v4663_v61 = vrot.slane %v4359_v63, 5  ;;  %v7461_v0 = vpop.f32.mrb[43].mxu1 }
 0xfe2   :  { %v4431_v1 = vpop.f32.mrb[44].mxu0 }
 0xfe3   :  { %v4664_v43 = vsel %vm94_vm8, %v4663_v61, %v4662_v45  ;;  %v4665_v5 = vrot.slane %v4431_v1, 4  ;;  %v7466_v46 = vpop.f32.mrb[45].mxu0 }
 0xfe4   :  { %v4503_v6 = vpop.f32.mrb[44].mxu1 }
 0xfe5   :  { %v4666_v12 = vsel %vm8684_vm9, %v4665_v5, %v4664_v43  ;;  %v4667_v57 = vrot.slane %v4503_v6, 3  ;;  %v7471_v14 = vpop.f32.mrb[45].mxu1 }
 0xfe6   :  { %v4575_v17 = vpop.f32.mrb[46].mxu0 }
 0xfe7   :  { %v4668_v26 = vsel %vm8683_vm10, %v4667_v57, %v4666_v12  ;;  %v4669_v18 = vrot.slane %v4575_v17, 2  ;;  %v7476_v20 = vpop.f32.mrb[47].mxu0 }
 0xfe8   :  { %v4647_v4 = vpop.f32.mrb[46].mxu1 }
 0xfe9   :  { %v4670_v60 = vsel %vm8682_vm11, %v4669_v18, %v4668_v26  ;;  %v4671_v22 = vrot.slane %v4647_v4, 1  ;;  %v7481_v7 = vpop.f32.mrb[47].mxu1 }
 0xfeb   :  { %v4672_v23 = vsel %vm8681_vm12, %v4671_v22, %v4670_v60 }
 0xfec   :  { %v4674_v24 = vmin.f32 %v8270_v13, %v4672_v23 }
 0xfee   :  { %v8353_v33 = vsel %vm8346_vm5, %v8270_v13, %v4674_v24 }
 0xfef   :  { %v4678_v36 = vsel %vm8346_vm5, inf, %v8353_v33 }
 0xff0   :  { %v4679_v41 = vsel %vm612_vm0, %v4678_v36, inf }
 0xff1   :  { %4680 = vmin.xlane.f32.xlu0 %v4679_v41 }
0x107e   :  { %v4681_v37 = vpop.xlane.xlu0 %4680 }
0x107f   :  { %vm4682_vm13 = vcmp.eq.f32.partialorder %v4678_v36, %v4681_v37 }
0x1080   :  { %v4683_v11 = vsel %vm4682_vm13, %v7687_v2, 8 }
0x1081   :  { %v4684_v34 = vsel %vm612_vm0, %v4683_v11, 2147483647 }
0x1082   :  { %v4686_v29 = vshra.s32 %v4684_v34, 16  ;;  %v4685_v39 = vand.u32 65535, %v4684_v34 }
0x1084   :  { %v4688_v38 = vcvt.s32.f32 %v4686_v29  ;;  %v4687_v13 = vcvt.s32.f32 %v4685_v39 }
0x1086   :  { %4689 = vmin.xlane.f32.xlu1 %v4688_v38 }
0x1113   :  { %v4690_v40 = vpop.xlane.xlu1 %4689 }
0x1114   :  { %vm4691_vm14 = vcmp.eq.f32.partialorder %v4688_v38, %v4690_v40  ;;  %v4696_v42 = vcvt.f32.s32 %v4690_v40 }
0x1115   :  { %v4692_v10 = vsel %vm4691_vm14, %v4687_v13, inf }
0x1116   :  { %4693 = vmin.xlane.f32.xlu0 %v4692_v10  ;;  %v4697_v48 = vshll.u32 %v4696_v42, 16  ;;  %v6055_v10 = vsub.s32 2, %v7767_v21 }
0x11a3   :  { %v4694_v44 = vpop.xlane.xlu0 %4693 }
0x11a4   :  { %v4695_v52 = vcvt.f32.s32 %v4694_v44 }
0x11a6   :  { %v8361_v53 = vadd.s32 %v4697_v48, %v4695_v52 }
0x11a8   :  { %vm4699_vm15 = vcmp.eq.s32.totalorder %v7687_v2, %v8361_v53 }
0x11a9   :  { %v7048_v27 = vsel %vm4699_vm15, 1.0, %v7666_v51  ;;  %vm8428_vm1 = vmor %vm8346_vm5, %vm4699_vm15 }
0x11aa   :  { %v4704_v50 = vcombine.high %v7048_v27, %v7048_v27  ;;  %v4711_v54 = vrot.slane %v7048_v27, %v7844_v59 }
0x11ac   :  { %v4719_v28 = vcombine.high %v4711_v54, %v4711_v54  ;;  %v4727_v55 = vrot.slane %v4711_v54, %v7844_v59  ;;  %v4718_v30 = vrot.slane %v4704_v50, %v7844_v59 }
0x11ae   :  { %v4741_v32 = vrot.slane %v4719_v28, %v7844_v59  ;;  %7485 = vmatmul.mubr.msk.f32.vlgmr.msra.gmra.mrb[48].mxu0 %vm612_vm0, %v4727_v55  ;;  %v4749_v31 = vcombine.high %v4727_v55, %v4727_v55  ;;  %v4720_v49 = vcombine.high %v4718_v30, %v4718_v30  ;;  %v4734_v62 = vrot.slane %v4718_v30, %v7844_v59 }
0x11af   :  { %7493 = vmatpush3.msra.mxu0 %v7875_v8  ;;  %7494 = vmatprep.mubr.msk.f32.mxu0 %vm7667_vm4, %v7666_v51 }
0x11b0   :  { %7490 = vmatmul.mubr.msk.f32.vlgmr.msra.gmra.mrb[48].mxu1 %vm612_vm0, %v4741_v32  ;;  %7502 = vmatprep.subr.mxu0 %v7666_v51  ;;  %v4751_v47 = vcombine.high %v4741_v32, %v4741_v32  ;;  %v4748_v63 = vrot.slane %v4720_v49, %v7844_v59  ;;  %v4750_v45 = vcombine.high %v4734_v62, %v4734_v62 }
0x11b1   :  { %7498 = vmatpush3.msra.mxu1 %v7877_v9  ;;  %7499 = vmatprep.mubr.msk.f32.mxu1 %vm7667_vm4, %v7666_v51 }
0x11b2   :  { %7495 = vmatmul.mubr.msk.f32.vlgmr.msra.gmra.mrb[50].mxu0 %vm612_vm0, %v4749_v31  ;;  %7507 = vmatprep.subr.mxu1 %v7666_v51  ;;  %v4752_v61 = vcombine.high %v4748_v63, %v4748_v63 }
0x11b3   :  { %7503 = vmatpush3.msra.mxu0 %v7887_v19  ;;  %7504 = vmatprep.mubr.msk.f32.mxu0 %vm7667_vm4, %v7666_v51 }
0x11b4   :  { %7500 = vmatmul.mubr.msk.f32.vlgmr.msra.gmra.mrb[50].mxu1 %vm612_vm0, %v4751_v47  ;;  %7512 = vmatprep.subr.mxu0 %v7666_v51 }
0x11b5   :  { %7508 = vmatpush3.msra.mxu1 %v7892_v58  ;;  %7509 = vmatprep.mubr.msk.f32.mxu1 %vm7667_vm4, %v7666_v51 }
0x11b6   :  { %7505 = vmatmul.mubr.msk.f32.vlgmr.msra.gmra.mrb[52].mxu0 %vm612_vm0, %v4734_v62  ;;  %7517 = vmatprep.subr.mxu1 %v7666_v51 }
0x11b7   :  { %7513 = vmatpush3.msra.mxu0 %v7902_v15  ;;  %7514 = vmatprep.mubr.msk.f32.mxu0 %vm7667_vm4, %v7666_v51 }
0x11b8   :  { %7510 = vmatmul.mubr.msk.f32.vlgmr.msra.gmra.mrb[52].mxu1 %vm612_vm0, %v4748_v63  ;;  %7522 = vmatprep.subr.mxu0 %v7666_v51 }
0x11b9   :  { %7518 = vmatpush3.msra.mxu1 %v7910_v35  ;;  %7519 = vmatprep.mubr.msk.f32.mxu1 %vm7667_vm4, %v7666_v51 }
0x11ba   :  { %7515 = vmatmul.mubr.msk.f32.vlgmr.msra.gmra.mrb[54].mxu0 %vm612_vm0, %v4750_v45  ;;  %7527 = vmatprep.subr.mxu1 %v7666_v51 }
0x11bb   :  { %7523 = vmatpush3.msra.mxu0 %v7815_v16  ;;  %7524 = vmatprep.mubr.msk.f32.mxu0 %vm7667_vm4, %v7666_v51 }
0x11bc   :  { %7520 = vmatmul.mubr.msk.f32.vlgmr.msra.gmra.mrb[54].mxu1 %vm612_vm0, %v4752_v61  ;;  %7532 = vmatprep.subr.mxu0 %v7666_v51 }
0x11bd   :  { %7528 = vmatpush3.msra.mxu1 %v7789_v56  ;;  %7529 = vmatprep.mubr.msk.f32.mxu1 %vm7667_vm4, %v7666_v51 }
0x11be   :  { %7537 = vmatprep.subr.mxu1 %v7666_v51 }
0x1281   :  { %v4821_v0 = vpop.f32.mrb[48].mxu0 }
0x1282   :  { %v7486_v1 = vpop.f32.mrb[49].mxu0 }
0x1283   :  { %v4893_v43 = vpop.f32.mrb[48].mxu1 }
0x1284   :  { %v5337_v5 = vrot.slane %v4893_v43, 7  ;;  %v7491_v46 = vpop.f32.mrb[49].mxu1 }
0x1285   :  { %v4965_v16 = vpop.f32.mrb[50].mxu0 }
0x1286   :  { %v5338_v6 = vsel %vm91_vm6, %v5337_v5, %v4821_v0  ;;  %v5339_v12 = vrot.slane %v4965_v16, 6  ;;  %v7496_v57 = vpop.f32.mrb[51].mxu0 }
0x1287   :  { %v5037_v14 = vpop.f32.mrb[50].mxu1 }
0x1288   :  { %v5340_v17 = vsel %vm92_vm7, %v5339_v12, %v5338_v6  ;;  %v5341_v26 = vrot.slane %v5037_v14, 5  ;;  %v7501_v56 = vpop.f32.mrb[51].mxu1 }
0x1289   :  { %v5109_v18 = vpop.f32.mrb[52].mxu0 }
0x128a   :  { %v5342_v20 = vsel %vm94_vm8, %v5341_v26, %v5340_v17  ;;  %v5343_v4 = vrot.slane %v5109_v18, 4  ;;  %v7506_v60 = vpop.f32.mrb[53].mxu0 }
0x128b   :  { %v5181_v22 = vpop.f32.mrb[52].mxu1 }
0x128c   :  { %v5344_v7 = vsel %vm8684_vm9, %v5343_v4, %v5342_v20  ;;  %v5345_v23 = vrot.slane %v5181_v22, 3  ;;  %v7511_v24 = vpop.f32.mrb[53].mxu1 }
0x128d   :  { %v5253_v36 = vpop.f32.mrb[54].mxu0 }
0x128e   :  { %v5346_v41 = vsel %vm8683_vm10, %v5345_v23, %v5344_v7  ;;  %v5347_v37 = vrot.slane %v5253_v36, 2  ;;  %v7516_v11 = vpop.f32.mrb[55].mxu0 }
0x128f   :  { %v5325_v34 = vpop.f32.mrb[54].mxu1 }
0x1290   :  { %v5348_v29 = vsel %vm8682_vm11, %v5347_v37, %v5346_v41  ;;  %v5349_v38 = vrot.slane %v5325_v34, 1  ;;  %v7521_v39 = vpop.f32.mrb[55].mxu1 }
0x1292   :  { %v5350_v40 = vsel %vm8681_vm12, %v5349_v38, %v5348_v29 }
0x1293   :  { %v5352_v13 = vmin.f32 %v8353_v33, %v5350_v40 }
0x1295   :  { %v8435_v42 = vsel %vm8428_vm1, %v8353_v33, %v5352_v13 }
0x1296   :  { %v5356_v44 = vsel %vm8428_vm1, inf, %v8435_v42 }
0x1297   :  { %v5357_v48 = vsel %vm612_vm0, %v5356_v44, inf }
0x1298   :  { %5358 = vmin.xlane.f32.xlu1 %v5357_v48 }
0x1325   :  { %v5359_v52 = vpop.xlane.xlu1 %5358 }
0x1326   :  { %vm5360_vm2 = vcmp.eq.f32.partialorder %v5356_v44, %v5359_v52 }
0x1327   :  { %v5361_v25 = vsel %vm5360_vm2, %v7687_v2, 8 }
0x1328   :  { %v5362_v53 = vsel %vm612_vm0, %v5361_v25, 2147483647 }
0x1329   :  { %v5364_v27 = vshra.s32 %v5362_v53, 16  ;;  %v5363_v54 = vand.u32 65535, %v5362_v53 }
0x132b   :  { %v5366_v50 = vcvt.s32.f32 %v5364_v27  ;;  %v5365_v33 = vcvt.s32.f32 %v5363_v54  ;;  %v6048_v54 = vsub.s32 1, %v7767_v21 }
0x132d   :  { %5367 = vmin.xlane.f32.xlu0 %v5366_v50 }
0x13ba   :  { %v5368_v28 = vpop.xlane.xlu0 %5367 }
0x13bb   :  { %vm5369_vm3 = vcmp.eq.f32.partialorder %v5366_v50, %v5368_v28  ;;  %v5374_v30 = vcvt.f32.s32 %v5368_v28  ;;  %v8509_v28 = vsub.s32 0, %v7767_v21 }
0x13bc   :  { %v5370_v55 = vsel %vm5369_vm3, %v5365_v33, inf }
0x13bd   :  { %5371 = vmin.xlane.f32.xlu1 %v5370_v55  ;;  %v5375_v31 = vshll.u32 %v5374_v30, 16 }
0x144a   :  { %v5372_v32 = vpop.xlane.xlu1 %5371 }
0x144b   :  { %v5373_v49 = vcvt.f32.s32 %v5372_v32 }
0x144d   :  { %v8443_v47 = vadd.s32 %v5375_v31, %v5373_v49 }
0x144f   :  { %vm5377_vm5 = vcmp.eq.s32.totalorder %v7687_v2, %v8443_v47 }
0x1450   :  { %v7057_v62 = vsel %vm5377_vm5, 1.0, %v7666_v51  ;;  %vm5378_vm13 = vmor %vm8428_vm1, %vm5377_vm5  ;;  %vm8528_vm1 = vcmp.lt.s32.totalorder %v7687_v2, %v7767_v21 }
0x1451   :  { %v5382_v63 = vcombine.high %v7057_v62, %v7057_v62  ;;  %v5389_v45 = vrot.slane %v7057_v62, %v7844_v59  ;;  %v6069_v62 = vsub.s32 4, %v7767_v21 }
0x1453   :  { %v5397_v61 = vcombine.high %v5389_v45, %v5389_v45  ;;  %v5405_v0 = vrot.slane %v5389_v45, %v7844_v59  ;;  %v5396_v1 = vrot.slane %v5382_v63, %v7844_v59  ;;  %v6076_v63 = vsub.s32 5, %v7767_v21 }
0x1455   :  { %v5419_v43 = vrot.slane %v5397_v61, %v7844_v59  ;;  %7525 = vmatmul.mubr.msk.f32.vlgmr.msra.gmra.mrb[56].mxu0 %vm612_vm0, %v5405_v0  ;;  %v5427_v5 = vcombine.high %v5405_v0, %v5405_v0  ;;  %v5398_v46 = vcombine.high %v5396_v1, %v5396_v1  ;;  %v6083_v0 = vsub.s32 6, %v7767_v21 }
0x1456   :  { %7533 = vmatpush3.msra.mxu0 %v7875_v8  ;;  %7534 = vmatprep.mubr.msk.f32.mxu0 %vm7667_vm4, %v7666_v51  ;;  %v5412_v8 = vrot.slane %v5396_v1, %v7844_v59  ;;  %v6090_v1 = vsub.s32 7, %v7767_v21 }
0x1457   :  { %7530 = vmatmul.mubr.msk.f32.vlgmr.msra.gmra.mrb[56].mxu1 %vm612_vm0, %v5419_v43  ;;  %7542 = vmatprep.subr.mxu0 %v7666_v51  ;;  %v5429_v16 = vcombine.high %v5419_v43, %v5419_v43 }
0x1458   :  { %7538 = vmatpush3.msra.mxu1 %v7877_v9  ;;  %7539 = vmatprep.mubr.msk.f32.mxu1 %vm7667_vm4, %v7666_v51  ;;  %v5426_v9 = vrot.slane %v5398_v46, %v7844_v59 }
0x1459   :  { %7535 = vmatmul.mubr.msk.f32.vlgmr.msra.gmra.mrb[58].mxu0 %vm612_vm0, %v5427_v5  ;;  %7547 = vmatprep.subr.mxu1 %v7666_v51 }
0x145a   :  { %7543 = vmatpush3.msra.mxu0 %v7887_v19  ;;  %7544 = vmatprep.mubr.msk.f32.mxu0 %vm7667_vm4, %v7666_v51  ;;  %v5428_v19 = vcombine.high %v5412_v8, %v5412_v8 }
0x145b   :  { %7540 = vmatmul.mubr.msk.f32.vlgmr.msra.gmra.mrb[58].mxu1 %vm612_vm0, %v5429_v16  ;;  %7552 = vmatprep.subr.mxu0 %v7666_v51 }
0x145c   :  { %7548 = vmatpush3.msra.mxu1 %v7892_v58  ;;  %7549 = vmatprep.mubr.msk.f32.mxu1 %vm7667_vm4, %v7666_v51  ;;  %v5430_v58 = vcombine.high %v5426_v9, %v5426_v9 }
0x145d   :  { %7545 = vmatmul.mubr.msk.f32.vlgmr.msra.gmra.mrb[60].mxu0 %vm612_vm0, %v5412_v8  ;;  %7557 = vmatprep.subr.mxu1 %v7666_v51 }
0x145e   :  { %7553 = vmatpush3.msra.mxu0 %v7902_v15  ;;  %7554 = vmatprep.mubr.msk.f32.mxu0 %vm7667_vm4, %v7666_v51 }
0x145f   :  { %7550 = vmatmul.mubr.msk.f32.vlgmr.msra.gmra.mrb[60].mxu1 %vm612_vm0, %v5426_v9  ;;  %7562 = vmatprep.subr.mxu0 %v7666_v51 }
0x1460   :  { %7558 = vmatpush3.msra.mxu1 %v7910_v35  ;;  %7559 = vmatprep.mubr.msk.f32.mxu1 %vm7667_vm4, %v7666_v51 }
0x1461   :  { %7555 = vmatmul.mubr.msk.f32.vlgmr.msra.gmra.mrb[62].mxu0 %vm612_vm0, %v5428_v19  ;;  %7567 = vmatprep.subr.mxu1 %v7666_v51 }
0x1462   :  { %7564 = vmatprep.mubr.msk.f32.mxu0 %vm7667_vm4, %v7666_v51 }
0x1463   :  { %7560 = vmatmul.mubr.msk.f32.vlgmr.msra.gmra.mrb[62].mxu1 %vm612_vm0, %v5430_v58 }
0x1464   :  { %7569 = vmatprep.mubr.msk.f32.mxu1 %vm7667_vm4, %v7666_v51 }
0x1528   :  { %v5499_v15 = vpop.f32.mrb[56].mxu0 }
0x1529   :  { %v7526_v6 = vpop.f32.mrb[57].mxu0 }
0x152a   :  { %v5571_v12 = vpop.f32.mrb[56].mxu1 }
0x152b   :  { %v6015_v35 = vrot.slane %v5571_v12, 7  ;;  %v7531_v57 = vpop.f32.mrb[57].mxu1 }
0x152c   :  { %v5643_v14 = vpop.f32.mrb[58].mxu0 }
0x152d   :  { %v6016_v17 = vsel %vm91_vm6, %v6015_v35, %v5499_v15  ;;  %v6017_v26 = vrot.slane %v5643_v14, 6  ;;  %v7536_v56 = vpop.f32.mrb[59].mxu0 }
0x152e   :  { %v5715_v18 = vpop.f32.mrb[58].mxu1 }
0x152f   :  { %v6018_v20 = vsel %vm92_vm7, %v6017_v26, %v6016_v17  ;;  %v6019_v4 = vrot.slane %v5715_v18, 5  ;;  %v7541_v60 = vpop.f32.mrb[59].mxu1 }
0x1530   :  { %v5787_v22 = vpop.f32.mrb[60].mxu0 }
0x1531   :  { %v6020_v7 = vsel %vm94_vm8, %v6019_v4, %v6018_v20  ;;  %v6021_v23 = vrot.slane %v5787_v22, 4  ;;  %v7546_v24 = vpop.f32.mrb[61].mxu0 }
0x1532   :  { %v5859_v36 = vpop.f32.mrb[60].mxu1 }
0x1533   :  { %v6022_v41 = vsel %vm8684_vm9, %v6021_v23, %v6020_v7  ;;  %v6023_v37 = vrot.slane %v5859_v36, 3  ;;  %v7551_v11 = vpop.f32.mrb[61].mxu1 }
0x1534   :  { %v5931_v34 = vpop.f32.mrb[62].mxu0 }
0x1535   :  { %v6024_v29 = vsel %vm8683_vm10, %v6023_v37, %v6022_v41  ;;  %v6025_v38 = vrot.slane %v5931_v34, 2  ;;  %v7556_v39 = vpop.f32.mrb[63].mxu0 }
0x1536   :  { %v6003_v40 = vpop.f32.mrb[62].mxu1 }
0x1537   :  { %v6026_v13 = vsel %vm8682_vm11, %v6025_v38, %v6024_v29  ;;  %v6027_v44 = vrot.slane %v6003_v40, 1  ;;  %v7561_v48 = vpop.f32.mrb[63].mxu1 }
0x1539   :  { %v6028_v52 = vsel %vm8681_vm12, %v6027_v44, %v6026_v13 }
0x153a   :  { %v6030_v25 = vmin.f32 %v8435_v42, %v6028_v52 }
0x153c   :  { %v6031_v53 = vsel %vm5378_vm13, %v8435_v42, %v6030_v25  ;;  %v6062_v42 = vsub.s32 3, %v7767_v21 }
0x153d   :  { %7635 = vrsqrt.f32 %v6031_v53  ;;  %vm6034_vm14 = vcmp.eq.f32.partialorder %v6031_v53, inf  ;;  %v6037_v33 = vand.u32 2147483648, %v6031_v53  ;;  %vm6036_vm15 = vcmp.eq.f32.partialorder %v6031_v53, 0.0 }
0x1547   :  { %v7636_v27 = vpop.eup %7635 }
0x1548   :  { %v6033_v50 = vmul.f32 %v7636_v27, %v6031_v53 }
0x154a   :  { %v6035_v55 = vsel %vm6034_vm14, %v6031_v53, %v6033_v50 }
0x154b   :  { %v6038_v30 = vsel %vm6036_vm15, %v6037_v33, %v6035_v55 }
0x154c   :  { %v6049_v32 = vrot.slane %v6038_v30, %v6048_v54  ;;  %v6042_v31 = vrot.slane %v6038_v30, %v8509_v28  ;;  %v6056_v49 = vrot.slane %v6038_v30, %v6055_v10  ;;  %v6063_v47 = vrot.slane %v6038_v30, %v6062_v42 }
0x154d   :  { %v6070_v45 = vrot.slane %v6038_v30, %v6069_v62  ;;  %v6077_v61 = vrot.slane %v6038_v30, %v6076_v63  ;;  %v6084_v43 = vrot.slane %v6038_v30, %v6083_v0  ;;  %v6091_v5 = vrot.slane %v6038_v30, %v6090_v1 }
0x154e   :  { %6051 = vbcast.lane.b32.xlu1 %v6049_v32, 256  ;;  %6044 = vbcast.lane.b32.xlu0 %v6042_v31, 256  ;;  %v6103_v46 = vrot.slane %v6038_v30, %v7844_v59  ;;  %v6096_v8 = vcombine.high %v6038_v30, %v6038_v30 }
0x1550   :  { %v6111_v16 = vcombine.high %v6103_v46, %v6103_v46  ;;  %v8520_v9 = vrot.slane %v6103_v46, %v7844_v59  ;;  %v6110_v58 = vrot.slane %v6096_v8, %v7844_v59 }
0x1552   :  { %6058 = vbcast.lane.b32.xlu1 %v6056_v49, 256  ;;  %6065 = vbcast.lane.b32.xlu0 %v6063_v47, 256  ;;  %v8523_v19 = vrot.slane %v6111_v16, %v7844_v59  ;;  %v6150_v6 = vrot.slane %v8520_v9, %v8509_v28  ;;  %v8538_v35 = vcombine.high %v8520_v9, %v8520_v9 }
0x1553   :  { %v6112_v14 = vcombine.high %v6110_v58, %v6110_v58  ;;  %v8547_v26 = vrot.slane %v6110_v58, %v7844_v59 }
0x1554   :  { %v6154_v12 = vrot.slane %v8523_v19, %v8509_v28  ;;  %v8542_v57 = vcombine.high %v8523_v19, %v8523_v19  ;;  %v6158_v56 = vrot.slane %v8538_v35, %v8509_v28 }
0x1555   :  { %v8554_v20 = vrot.slane %v6112_v14, %v7844_v59  ;;  %v6166_v59 = vrot.slane %v8547_v26, %v8509_v28  ;;  %v8570_v37 = vcombine.high %v8547_v26, %v8547_v26 }
0x1556   :  { %6072 = vbcast.lane.b32.xlu1 %v6070_v45, 256  ;;  %6079 = vbcast.lane.b32.xlu0 %v6077_v61, 256  ;;  %v6162_v18 = vrot.slane %v8542_v57, %v8509_v28 }
0x1557   :  { %v6170_v24 = vrot.slane %v8554_v20, %v8509_v28  ;;  %v8577_v39 = vcombine.high %v8554_v20, %v8554_v20  ;;  %v6174_v50 = vrot.slane %v8570_v37, %v8509_v28 }
0x1559   :  { %v6178_v55 = vrot.slane %v8577_v39, %v8509_v28 }
0x155a   :  { %6086 = vbcast.lane.b32.xlu1 %v6084_v43, 256  ;;  %6093 = vbcast.lane.b32.xlu0 %v6091_v5, 256 }
0x15c0   :  { %v6052_v17 = vpop.permute.xlu1 %6051  ;;  %v6045_v21 = vpop.permute.xlu0 %6044 }
0x15c1   :  { %vm6188_vm2 = vcmp.lt.f32.partialorder %v6154_v12, %v6052_v17  ;;  %vm6196_vm3 = vcmp.eq.f32.partialorder %v6154_v12, %v6052_v17  ;;  %vm6195_vm5 = vcmp.eq.f32.partialorder %v6150_v6, %v6045_v21  ;;  %vm6187_vm14 = vcmp.lt.f32.partialorder %v6150_v6, %v6045_v21 }
0x15c2   :  { %vm6205_vm13 = vmand %vm6196_vm3, %vm8528_vm1 }
0x15c3   :  { %vm6213_vm15 = vmor %vm6188_vm2, %vm6205_vm13 }
0x15c4   :  { %v6221_v4 = vsel %vm6213_vm15, 1, %v7661_v3  ;;  %vm6204_vm12 = vmand %vm6195_vm5, %vm8528_vm1  ;;  %v6059_v60 = vpop.permute.xlu1 %6058  ;;  %v6066_v22 = vpop.permute.xlu0 %6065 }
0x15c5   :  { %vm6212_vm3 = vmor %vm6187_vm14, %vm6204_vm12  ;;  %vm6189_vm11 = vcmp.lt.f32.partialorder %v6158_v56, %v6059_v60  ;;  %vm6197_vm10 = vcmp.eq.f32.partialorder %v6158_v56, %v6059_v60  ;;  %vm6198_vm2 = vcmp.eq.f32.partialorder %v6162_v18, %v6066_v22  ;;  %vm6190_vm9 = vcmp.lt.f32.partialorder %v6162_v18, %v6066_v22 }
0x15c6   :  { %v6220_v7 = vsel %vm6212_vm3, 1, %v7661_v3  ;;  %vm6206_vm13 = vmand %vm6197_vm10, %vm8528_vm1  ;;  %v6241_v23 = vsel %vm612_vm0, %v6221_v4, 0 }
0x15c7   :  { %vm6214_vm15 = vmor %vm6189_vm11, %vm6206_vm13  ;;  %v6243_v36 = vshrl.u32 %v6241_v23, 16  ;;  %v6228_v41 = vsel %vm612_vm0, %v6220_v7, 0  ;;  %v6242_v40 = vand.u32 65535, %v6241_v23 }
0x15c8   :  { %v6222_v11 = vsel %vm6214_vm15, 1, %v7661_v3  ;;  %vm6207_vm10 = vmand %vm6198_vm2, %vm8528_vm1  ;;  %v6073_v34 = vpop.permute.xlu1 %6072  ;;  %v6080_v29 = vpop.permute.xlu0 %6079  ;;  %v6230_v38 = vshrl.u32 %v6228_v41, 16  ;;  %v6229_v13 = vand.u32 65535, %v6228_v41 }
0x15c9   :  { %vm6215_vm11 = vmor %vm6190_vm9, %vm6207_vm10  ;;  %vm6191_vm12 = vcmp.lt.f32.partialorder %v6166_v59, %v6073_v34  ;;  %vm6199_vm5 = vcmp.eq.f32.partialorder %v6166_v59, %v6073_v34  ;;  %vm6200_vm14 = vcmp.eq.f32.partialorder %v6170_v24, %v6080_v29  ;;  %vm6192_vm2 = vcmp.lt.f32.partialorder %v6170_v24, %v6080_v29 }
0x15ca   :  { %v6223_v44 = vsel %vm6215_vm11, 1, %v7661_v3  ;;  %vm6208_vm3 = vmand %vm6199_vm5, %vm8528_vm1  ;;  %v6245_v48 = vcvt.s32.f32 %v6243_v36  ;;  %v6232_v52 = vcvt.s32.f32 %v6230_v38  ;;  %v6254_v53 = vsel %vm612_vm0, %v6222_v11, 0 }
0x15cb   :  { %vm8583_vm13 = vmor %vm6191_vm12, %vm6208_vm3  ;;  %v6267_v27 = vsel %vm612_vm0, %v6223_v44, 0  ;;  %v6244_v30 = vcvt.s32.f32 %v6242_v40  ;;  %v6231_v32 = vcvt.s32.f32 %v6229_v13  ;;  %v6256_v31 = vshrl.u32 %v6254_v53, 16 }
0x15cc   :  { %vm6209_vm9 = vmand %vm6200_vm14, %vm8528_vm1  ;;  %6248 = vadd.xlane.f32.xlu0 %v6245_v48  ;;  %6235 = vadd.xlane.f32.xlu1 %v6232_v52  ;;  %v6087_v54 = vpop.permute.xlu1 %6086  ;;  %v6094_v33 = vpop.permute.xlu0 %6093  ;;  %v6269_v10 = vshrl.u32 %v6267_v27, 16  ;;  %v6224_v42 = vsel %vm8583_vm13, 1, %v7661_v3  ;;  %v6255_v47 = vand.u32 65535, %v6254_v53  ;;  %v6268_v63 = vand.u32 65535, %v6267_v27 }
0x15cd   :  { %vm6217_vm15 = vmor %vm6192_vm2, %vm6209_vm9  ;;  %vm6201_vm10 = vcmp.eq.f32.partialorder %v6174_v50, %v6087_v54  ;;  %vm6202_vm11 = vcmp.eq.f32.partialorder %v6178_v55, %v6094_v33  ;;  %vm6193_vm12 = vcmp.lt.f32.partialorder %v6174_v50, %v6087_v54  ;;  %vm6194_vm14 = vcmp.lt.f32.partialorder %v6178_v55, %v6094_v33 }
0x15ce   :  { %v6225_v49 = vsel %vm6217_vm15, 1, %v7661_v3  ;;  %vm6210_vm5 = vmand %vm6201_vm10, %vm8528_vm1  ;;  %v6258_v28 = vcvt.s32.f32 %v6256_v31  ;;  %v6271_v62 = vcvt.s32.f32 %v6269_v10  ;;  %v6280_v45 = vsel %vm612_vm0, %v6224_v42, 0 }
0x15cf   :  { %vm6211_vm3 = vmand %vm6202_vm11, %vm8528_vm1  ;;  %v6293_v61 = vsel %vm612_vm0, %v6225_v49, 0  ;;  %v6257_v0 = vcvt.s32.f32 %v6255_v47  ;;  %v6270_v1 = vcvt.s32.f32 %v6268_v63  ;;  %v6282_v43 = vshrl.u32 %v6280_v45, 16 }
0x15d0   :  { %6246 = vadd.xlane.f32.xlu1 %v6244_v30  ;;  %6233 = vadd.xlane.f32.xlu0 %v6231_v32  ;;  %vm6218_vm2 = vmor %vm6193_vm12, %vm6210_vm5  ;;  %v6295_v5 = vshrl.u32 %v6293_v61, 16  ;;  %v6281_v15 = vand.u32 65535, %v6280_v45  ;;  %v6294_v6 = vand.u32 65535, %v6293_v61  ;;  %v7669_v47 = vmov 1.0  }
0x15d1   :  { %vm6219_vm13 = vmor %vm6194_vm14, %vm6211_vm3  ;;  %v6226_v46 = vsel %vm6218_vm2, 1, %v7661_v3  ;;  %v6284_v8 = vcvt.s32.f32 %v6282_v43 }
0x15d2   :  { %v6227_v16 = vsel %vm6219_vm13, 1, %v7661_v3  ;;  %v6297_v58 = vcvt.s32.f32 %v6295_v5  ;;  %v6306_v12 = vsel %vm612_vm0, %v6226_v46, 0  ;;  %v6283_v17 = vcvt.s32.f32 %v6281_v15 }
0x15d3   :  { %v6319_v14 = vsel %vm612_vm0, %v6227_v16, 0  ;;  %v6296_v21 = vcvt.s32.f32 %v6294_v6  ;;  %v6308_v56 = vshrl.u32 %v6306_v12, 16  ;;  %v6307_v60 = vand.u32 65535, %v6306_v12 }
0x15d4   :  { %6261 = vadd.xlane.f32.xlu0 %v6258_v28  ;;  %6274 = vadd.xlane.f32.xlu1 %v6271_v62  ;;  %v6321_v18 = vshrl.u32 %v6319_v14, 16  ;;  %v6320_v22 = vand.u32 65535, %v6319_v14 }
0x15d5   :  { %v6310_v4 = vcvt.s32.f32 %v6308_v56  ;;  %v6309_v7 = vcvt.s32.f32 %v6307_v60 }
0x15d6   :  { %v6323_v3 = vcvt.s32.f32 %v6321_v18  ;;  %v6322_v59 = vcvt.s32.f32 %v6320_v22 }
0x15d8   :  { %6259 = vadd.xlane.f32.xlu0 %v6257_v0  ;;  %6272 = vadd.xlane.f32.xlu1 %v6270_v1 }
0x15dc   :  { %6287 = vadd.xlane.f32.xlu0 %v6284_v8  ;;  %6300 = vadd.xlane.f32.xlu1 %v6297_v58 }
0x15e0   :  { %6285 = vadd.xlane.f32.xlu0 %v6283_v17  ;;  %6298 = vadd.xlane.f32.xlu1 %v6296_v21 }
0x15e4   :  { %6313 = vadd.xlane.f32.xlu0 %v6310_v4  ;;  %6326 = vadd.xlane.f32.xlu1 %v6323_v3 }
0x15e8   :  { %6311 = vadd.xlane.f32.xlu0 %v6309_v7  ;;  %6324 = vadd.xlane.f32.xlu1 %v6322_v59 }
0x1659   :  { %v6236_v23 = vpop.xlane.xlu1 %6235  ;;  %v6249_v24 = vpop.xlane.xlu0 %6248 }
0x165a   :  { %v6238_v36 = vcvt.f32.s32 %v6236_v23  ;;  %v6251_v41 = vcvt.f32.s32 %v6249_v24 }
0x165c   :  { %v6239_v29 = vshll.u32 %v6238_v36, 16  ;;  %v6252_v38 = vshll.u32 %v6251_v41, 16 }
0x165d   :  { %v6247_v11 = vpop.xlane.xlu1 %6246  ;;  %v6234_v34 = vpop.xlane.xlu0 %6233 }
0x165e   :  { %v6250_v40 = vcvt.f32.s32 %v6247_v11  ;;  %v6237_v13 = vcvt.f32.s32 %v6234_v34 }
0x1660   :  { %v6253_v44 = vadd.s32 %v6252_v38, %v6250_v40  ;;  %v6240_v48 = vadd.s32 %v6239_v29, %v6237_v13 }
0x1661   :  { %v6275_v52 = vpop.xlane.xlu1 %6274  ;;  %v6262_v25 = vpop.xlane.xlu0 %6261 }
0x1662   :  { %vm6333_vm1 = vcmp.eq.s32.totalorder %v6253_v44, 0  ;;  %v7067_v53 = vadd.s32 4294967295, %v6253_v44  ;;  %vm6332_vm9 = vcmp.eq.s32.totalorder %v6240_v48, 0  ;;  %v7066_v27 = vadd.s32 4294967295, %v6240_v48 }
0x1663   :  { %v6277_v50 = vcvt.f32.s32 %v6275_v52  ;;  %v6264_v54 = vcvt.f32.s32 %v6262_v25 }
0x1664   :  { %v6349_v33 = vsel %vm6333_vm1, 7, %v7067_v53  ;;  %v6348_v55 = vsel %vm6332_vm9, 7, %v7066_v27 }
0x1665   :  { %v6273_v30 = vpop.xlane.xlu1 %6272  ;;  %v6260_v32 = vpop.xlane.xlu0 %6259  ;;  %vm6356_vm15 = vcmp.eq.s32.totalorder %v6348_v55, %v7687_v2  ;;  %vm6357_vm10 = vcmp.eq.s32.totalorder %v6349_v33, %v7687_v2  ;;  %v6278_v31 = vshll.u32 %v6277_v50, 16  ;;  %v6265_v10 = vshll.u32 %v6264_v54, 16 }
0x1666   :  { %v6276_v42 = vcvt.f32.s32 %v6273_v30  ;;  %v6263_v49 = vcvt.f32.s32 %v6260_v32  ;;  %7563 = vmatpush3.msk.msra.mxu0 %vm6356_vm15, %v7669_v47  ;;  %7568 = vmatpush3.msk.msra.mxu1 %vm6357_vm10, %v7669_v47 }
0x1667   :  { %7565 = vmatmul.mubr.msk.f32.vlgmr.msra.gmra.mrb[64].mxu0 %vm612_vm0, %v8520_v9  ;;  %7570 = vmatmul.mubr.msk.f32.vlgmr.msra.gmra.mrb[64].mxu1 %vm612_vm0, %v8523_v19 }
0x1668   :  { %v6279_v28 = vadd.s32 %v6278_v31, %v6276_v42  ;;  %v6266_v62 = vadd.s32 %v6265_v10, %v6263_v49  ;;  %7572 = vmatprep.subr.mxu0 %v7666_v51  ;;  %7577 = vmatprep.subr.mxu1 %v7666_v51 }
0x1669   :  { %v6301_v63 = vpop.xlane.xlu1 %6300  ;;  %v6288_v45 = vpop.xlane.xlu0 %6287  ;;  %7574 = vmatprep.mubr.msk.f32.mxu0 %vm7667_vm4, %v7666_v51  ;;  %7579 = vmatprep.mubr.msk.f32.mxu1 %vm7667_vm4, %v7666_v51 }
0x166a   :  { %vm6335_vm11 = vcmp.eq.s32.totalorder %v6279_v28, 0  ;;  %v7069_v61 = vadd.s32 4294967295, %v6279_v28  ;;  %vm6334_vm12 = vcmp.eq.s32.totalorder %v6266_v62, 0  ;;  %v7068_v9 = vadd.s32 4294967295, %v6266_v62 }
0x166b   :  { %v6303_v0 = vcvt.f32.s32 %v6301_v63  ;;  %v6290_v19 = vcvt.f32.s32 %v6288_v45 }
0x166c   :  { %v6351_v1 = vsel %vm6335_vm11, 7, %v7069_v61  ;;  %v6350_v43 = vsel %vm6334_vm12, 7, %v7068_v9  ;;  %vm8700_vm12 = vcmask 1045509  }
0x166d   :  { %v6299_v5 = vpop.xlane.xlu1 %6298  ;;  %v6286_v46 = vpop.xlane.xlu0 %6285  ;;  %vm6358_vm5 = vcmp.eq.s32.totalorder %v6350_v43, %v7687_v2  ;;  %vm6359_vm14 = vcmp.eq.s32.totalorder %v6351_v1, %v7687_v2  ;;  %v6304_v16 = vshll.u32 %v6303_v0, 16  ;;  %v6291_v8 = vshll.u32 %v6290_v19, 16 }
0x166e   :  { %v6302_v58 = vcvt.f32.s32 %v6299_v5  ;;  %v6289_v15 = vcvt.f32.s32 %v6286_v46  ;;  %7573 = vmatpush3.msk.msra.mxu0 %vm6358_vm5, %v7669_v47  ;;  %7578 = vmatpush3.msk.msra.mxu1 %vm6359_vm14, %v7669_v47 }
0x166f   :  { %7575 = vmatmul.mubr.msk.f32.vlgmr.msra.gmra.mrb[66].mxu0 %vm612_vm0, %v8538_v35  ;;  %7580 = vmatmul.mubr.msk.f32.vlgmr.msra.gmra.mrb[66].mxu1 %vm612_vm0, %v8542_v57 }
0x1670   :  { %v6305_v6 = vadd.s32 %v6304_v16, %v6302_v58  ;;  %v6292_v12 = vadd.s32 %v6291_v8, %v6289_v15  ;;  %7582 = vmatprep.subr.mxu0 %v7666_v51  ;;  %7587 = vmatprep.subr.mxu1 %v7666_v51 }
0x1671   :  { %v6327_v14 = vpop.xlane.xlu1 %6326  ;;  %v6314_v17 = vpop.xlane.xlu0 %6313  ;;  %7584 = vmatprep.mubr.msk.f32.mxu0 %vm7667_vm4, %v7666_v51  ;;  %7589 = vmatprep.mubr.msk.f32.mxu1 %vm7667_vm4, %v7666_v51 }
0x1672   :  { %vm6337_vm3 = vcmp.eq.s32.totalorder %v6305_v6, 0  ;;  %v7071_v21 = vadd.s32 4294967295, %v6305_v6  ;;  %vm6336_vm2 = vcmp.eq.s32.totalorder %v6292_v12, 0  ;;  %v7070_v35 = vadd.s32 4294967295, %v6292_v12 }
0x1673   :  { %v6329_v56 = vcvt.f32.s32 %v6327_v14  ;;  %v6316_v57 = vcvt.f32.s32 %v6314_v17 }
0x1674   :  { %v6353_v18 = vsel %vm6337_vm3, 7, %v7071_v21  ;;  %v6352_v4 = vsel %vm6336_vm2, 7, %v7070_v35 }
0x1675   :  { %v6325_v3 = vpop.xlane.xlu1 %6324  ;;  %v6312_v60 = vpop.xlane.xlu0 %6311  ;;  %vm6360_vm13 = vcmp.eq.s32.totalorder %v6352_v4, %v7687_v2  ;;  %vm6361_vm1 = vcmp.eq.s32.totalorder %v6353_v18, %v7687_v2  ;;  %v6330_v22 = vshll.u32 %v6329_v56, 16  ;;  %v6317_v7 = vshll.u32 %v6316_v57, 16 }
0x1676   :  { %v6328_v59 = vcvt.f32.s32 %v6325_v3  ;;  %v6315_v23 = vcvt.f32.s32 %v6312_v60  ;;  %7583 = vmatpush3.msk.msra.mxu0 %vm6360_vm13, %v7669_v47  ;;  %7588 = vmatpush3.msk.msra.mxu1 %vm6361_vm1, %v7669_v47 }
0x1677   :  { %7585 = vmatmul.mubr.msk.f32.vlgmr.msra.gmra.mrb[68].mxu0 %vm612_vm0, %v8547_v26  ;;  %7590 = vmatmul.mubr.msk.f32.vlgmr.msra.gmra.mrb[68].mxu1 %vm612_vm0, %v8554_v20 }
0x1678   :  { %v6331_v24 = vadd.s32 %v6330_v22, %v6328_v59  ;;  %v6318_v36 = vadd.s32 %v6317_v7, %v6315_v23  ;;  %7592 = vmatprep.subr.mxu0 %v7666_v51  ;;  %7597 = vmatprep.subr.mxu1 %v7666_v51 }
0x1679   :  { %7594 = vmatprep.mubr.msk.f32.mxu0 %vm7667_vm4, %v7666_v51  ;;  %7599 = vmatprep.mubr.msk.f32.mxu1 %vm7667_vm4, %v7666_v51  ;;  %vm8699_vm4 = vcmask 1044484  }
0x167a   :  { %vm6339_vm9 = vcmp.eq.s32.totalorder %v6331_v24, 0  ;;  %v7073_v41 = vadd.s32 4294967295, %v6331_v24  ;;  %vm6338_vm15 = vcmp.eq.s32.totalorder %v6318_v36, 0  ;;  %v7072_v11 = vadd.s32 4294967295, %v6318_v36 }
0x167c   :  { %v6355_v26 = vsel %vm6339_vm9, 7, %v7073_v41  ;;  %v6354_v34 = vsel %vm6338_vm15, 7, %v7072_v11 }
0x167d   :  { %vm6362_vm10 = vcmp.eq.s32.totalorder %v6354_v34, %v7687_v2  ;;  %vm6363_vm11 = vcmp.eq.s32.totalorder %v6355_v26, %v7687_v2 }
0x167e   :  { %7593 = vmatpush3.msk.msra.mxu0 %vm6362_vm10, %v7669_v47  ;;  %7598 = vmatpush3.msk.msra.mxu1 %vm6363_vm11, %v7669_v47 }
0x167f   :  { %7595 = vmatmul.mubr.msk.f32.vlgmr.msra.gmra.mrb[70].mxu0 %vm612_vm0, %v8570_v37  ;;  %7600 = vmatmul.mubr.msk.f32.vlgmr.msra.gmra.mrb[70].mxu1 %vm612_vm0, %v8577_v39 }
0x173a   :  { %v6448_v51 = vpop.f32.mrb[64].mxu0  ;;  %v6520_v20 = vpop.f32.mrb[64].mxu1 }
0x173b   :  { %v6964_v29 = vrot.slane %v6520_v20, 7  ;;  %v7566_v38 = vpop.f32.mrb[65].mxu0  ;;  %v7571_v40 = vpop.f32.mrb[65].mxu1 }
0x173d   :  { %v6965_v13 = vsel %vm91_vm6, %v6964_v29, %v6448_v51  ;;  %vm8701_vm6 = vcmask 1046534  }
0x1742   :  { %v6592_v44 = vpop.f32.mrb[66].mxu0  ;;  %v6664_v48 = vpop.f32.mrb[66].mxu1 }
0x1743   :  { %v6966_v2 = vrot.slane %v6592_v44, 6  ;;  %v6968_v52 = vrot.slane %v6664_v48, 5  ;;  %v7576_v25 = vpop.f32.mrb[67].mxu0  ;;  %v7581_v53 = vpop.f32.mrb[67].mxu1 }
0x1745   :  { %v6967_v27 = vsel %vm92_vm7, %v6966_v2, %v6965_v13  ;;  %vm8702_vm7 = vcmask 1047559  }
0x1746   :  { %v6969_v37 = vsel %vm94_vm8, %v6968_v52, %v6967_v27 }
0x174a   :  { %v6736_v50 = vpop.f32.mrb[68].mxu0  ;;  %v6808_v54 = vpop.f32.mrb[68].mxu1 }
0x174b   :  { %v6970_v39 = vrot.slane %v6736_v50, 4  ;;  %v6972_v33 = vrot.slane %v6808_v54, 3  ;;  %v7586_v55 = vpop.f32.mrb[69].mxu0  ;;  %v7591_v30 = vpop.f32.mrb[69].mxu1 }
0x174d   :  { %v6971_v32 = vsel %vm8699_vm4, %v6970_v39, %v6969_v37 }
0x174e   :  { %v6973_v31 = vsel %vm8700_vm12, %v6972_v33, %v6971_v32 }
0x1752   :  { %v6880_v10 = vpop.f32.mrb[70].mxu0  ;;  %v6952_v42 = vpop.f32.mrb[70].mxu1 }
0x1753   :  { %v6974_v49 = vrot.slane %v6880_v10, 2  ;;  %v6976_v47 = vrot.slane %v6952_v42, 1  ;;  %v7596_v28 = vpop.f32.mrb[71].mxu0  ;;  %v7601_v62 = vpop.f32.mrb[71].mxu1 }
0x1755   :  { %v6975_v63 = vsel %vm8701_vm6, %v6974_v49, %v6973_v31 }
0x1756   :  { %v6977_v45 = vsel %vm8702_vm7, %v6976_v47, %v6975_v63 }
0x1757   :  { %6979 = vst.msk [vmem:[#allocation2] sm:$0xff] %vm612_vm0, %v6977_v45 }
0x1758   :  { %7648 = shalt.err (!%p7645_p4)
}
0x1759   :  { %s7649_s26 = scalar_lea.hbm %s8680_s1, 128 }
0x175a   :  { %p7650_p5 = scmp.ne.s32.totalorder %s8680_s1, %s7649_s26  ;;  %p7653_p6 = scmp.lt.u32.totalorder %s7649_s26, %s8680_s1 }
0x175c   :  { %p7655_p7 = pnand %p7653_p6, %p7650_p5 }
0x175e   :  { %7658 = shalt.err (!%p7655_p7)
}
0x175f   :  { %6989 = dma.vmem_to_hbm [thread:$0]  %s6987_s22, 128, %s8680_s1, [#allocation3]  }
0x1760   :  { %7659 = dma.done.wait [#allocation3], 128  }
0x1761   :  { %7660 = vsyncadd [#allocation3], 4294967168 }
0x1762   :  { %6993 = vsyncpa [#allocation3], 1 }

</bundles_post_ra>
